<compile_context>
chip_gen: v6e
topology: v6e:2x2x1
jax: 0.10.0
libtpu: 0.0.40
codegen_flags: <defaults>
</compile_context>

<pallas_src>
import functools

import jax
import jax.numpy as jnp
from jax import lax
from jax.experimental import pallas as pl
from jax.experimental.pallas import tpu as pltpu


def _srl(x, n):
    """Logical right shift of an int32 array by a static amount."""
    return lax.shift_right_logical(x, jnp.int32(n))


def _stochastic_pool_kernel(seed_ref, x_ref, out_ref, *,
                            kh, kw, sh, sw, band_oh, ow, lane_block, num_c):
    """One grid step.

    x_ref:   (in_band_h, W, lane_block)   halo'd input row band, channel-last
    out_ref: (band_oh,   OW, lane_block)  pooled output band
    """
    ci = pl.program_id(0)          # lane-slab index
    ti = pl.program_id(1)          # OH row-band index
    k = kh * kw
    shp = (band_oh, ow, lane_block)
    f32 = jnp.float32

    def window(i, j):
        # Window offsets land on leading / sublane dims (lanes untouched).
        rows = slice(i, i + band_oh) if sh == 1 else pl.ds(i, band_oh, stride=sh)
        cols = slice(j, j + ow) if sw == 1 else pl.ds(j, ow, stride=sw)
        return x_ref[rows, cols, :]

    # ---- uniform u in [0, 1): counter-based hash (portable, no pltpu.prng_*).
    # Independent of x, so it overlaps the pipelined input DMA.  The block id
    # is folded into the scalar seed; the vector counter is only block-local.
    block_id = ti * num_c + ci
    hseed = (seed_ref[0] + block_id * jnp.int32(-2048144789)) * jnp.int32(-1640531535)
    ctr = ((lax.broadcasted_iota(jnp.int32, shp, 0) * jnp.int32(ow)
            + lax.broadcasted_iota(jnp.int32, shp, 1)) * jnp.int32(lane_block)
           + lax.broadcasted_iota(jnp.int32, shp, 2))
    h = ctr ^ hseed
    h = (h ^ _srl(h, 16)) * jnp.int32(-2048144789)   # 0x85EBCA6B
    h = (h ^ _srl(h, 13)) * jnp.int32(-1028477387)   # 0xC2B2AE35
    h = h ^ _srl(h, 16)
    u = _srl(h, 8).astype(f32) * f32(1.0 / (1 << 24))

    # ---- pass 1: streaming ReLU window sum (one window resident at a time) --
    total = jnp.maximum(window(0, 0), 0).astype(f32)
    for kk in range(1, k):
        i, j = divmod(kk, kw)
        total = total + jnp.maximum(window(i, j), 0).astype(f32)

    has_pos = total > f32(0.0)
    # total == 0  ->  torch's prob[prob != prob] = 1  ->  uniform over window.
    fill = jnp.where(has_pos, f32(0.0), f32(1.0))     # per-slot weight add-on
    wtot = jnp.where(has_pos, total, f32(k))
    r = u * wtot                                      # running remainder in [0, wtot)

    # ---- pass 2: streaming inverse-CDF selection (monotone, clamp-to-last) --
    xv = window(0, 0)
    chosen = xv                                       # slot 0 always admissible (r >= 0)
    r = r - (jnp.maximum(xv, 0).astype(f32) + fill)
    for kk in range(1, k):
        i, j = divmod(kk, kw)
        xv = window(i, j)
        w_kk = jnp.maximum(xv, 0).astype(f32) + fill
        chosen = jnp.where(r >= f32(0.0), xv, chosen)  # gather ORIGINAL (pre-ReLU) value
        r = r - w_kk

    out_ref[...] = chosen.astype(out_ref.dtype)


def _vmem_limit_bytes():
    """Per-generation scoped-VMEM limit (96 MiB on 128-MiB parts, <=48 MiB on v7x)."""
    kind = ""
    try:
        kind = jax.devices()[0].device_kind.lower()
    except Exception:
        pass
    if "v7" in kind or "7x" in kind:
        return 48 * 1024 * 1024
    if "v5" in kind or "v6" in kind:
        return 96 * 1024 * 1024
    return 32 * 1024 * 1024          # unknown part: documented-safe default


def _choose_tiling(h, w, oh, ow, nc, kh, sh, itemsize, budget_bytes):
    """Pick (lane_block, num_c, band_oh, num_bands) under a per-step VMEM budget."""
    lane_block = nc if nc <= 128 else 128          # full 128-lane slabs when N*C >= 128
    num_c = -(-nc // lane_block)

    def step_bytes(b):                             # live bytes per grid step
        in_rows = (b - 1) * sh + kh
        return (2 * in_rows * w * lane_block * itemsize    # double-buffered input band
                + 2 * b * ow * lane_block * itemsize        # double-buffered output
                + 8 * b * ow * lane_block * 4)              # f32 temporaries / slack

    band_oh = oh
    while band_oh > 1 and step_bytes(band_oh) > budget_bytes:
        band_oh = (band_oh + 1) // 2

    # >= ~4 grid steps so v7x's 2 TensorCores both get work and DMA overlaps compute.
    min_steps = 4
    if num_c * (-(-oh // band_oh)) < min_steps:
        want_bands = min(oh, -(-min_steps // num_c))
        band_oh = min(band_oh, -(-oh // want_bands))
    num_bands = -(-oh // band_oh)
    return lane_block, num_c, band_oh, num_bands


@functools.partial(jax.jit, static_argnames=("kernel_size", "stride"))
def stochastic_pool2d(x, seed, kernel_size=3, stride=1):
    """Forward pass of StochasticPool2D (valid padding). x: (N,C,H,W) -> (N,C,OH,OW)."""
    kh = kw = int(kernel_size)
    sh = sw = int(stride)
    n, c, h, w = x.shape
    oh = (h - kh) // sh + 1
    ow = (w - kw) // sw + 1
    nc = n * c

    vmem_limit = _vmem_limit_bytes()
    lane_block, num_c, band_oh, num_bands = _choose_tiling(
        h, w, oh, ow, nc, kh, sh, jnp.dtype(x.dtype).itemsize, vmem_limit // 2)
    nc_pad = num_c * lane_block
    oh_pad = num_bands * band_oh
    in_band_h = (band_oh - 1) * sh + kh

    # Channel-last, lane-dense layout: (H, W, N*C) puts N*C on the 128-lane axis.
    x_t = jnp.transpose(x.reshape(nc, h, w), (1, 2, 0))
    h_need = (oh_pad - 1) * sh + kh
    pad_h = max(0, h_need - h)
    pad_c = nc_pad - nc
    if pad_h or pad_c:
        x_t = jnp.pad(x_t, ((0, pad_h), (0, 0), (0, pad_c)))

    # Pre-gather overlapping OH row bands (kh - sh halo) so the kernel input can
    # use plain Blocked BlockSpecs (auto double-buffered DMA) - no halo DMA logic.
    if num_bands == 1:
        x_bands = x_t[None, :in_band_h]
    else:
        row_idx = (jnp.arange(num_bands, dtype=jnp.int32)[:, None] * (band_oh * sh)
                   + jnp.arange(in_band_h, dtype=jnp.int32)[None, :])
        x_bands = jnp.take(x_t, row_idx, axis=0)   # (num_bands, in_band_h, W, nc_pad)

    seed_arr = jnp.asarray(seed, dtype=jnp.int32).reshape((1,))

    kernel = functools.partial(
        _stochastic_pool_kernel,
        kh=kh, kw=kw, sh=sh, sw=sw,
        band_oh=band_oh, ow=ow, lane_block=lane_block, num_c=num_c)

    out = pl.pallas_call(
        kernel,
        out_shape=jax.ShapeDtypeStruct((oh_pad, ow, nc_pad), x.dtype),
        grid_spec=pltpu.PrefetchScalarGridSpec(
            num_scalar_prefetch=1,
            grid=(num_c, num_bands),
            in_specs=[pl.BlockSpec((None, in_band_h, w, lane_block),
                                   lambda ci, ti, seed_ref: (ti, 0, 0, ci))],
            out_specs=pl.BlockSpec((band_oh, ow, lane_block),
                                   lambda ci, ti, seed_ref: (ti, 0, ci)),
        ),
        compiler_params=pltpu.CompilerParams(
            dimension_semantics=("parallel", "parallel"),
            vmem_limit_bytes=vmem_limit,
        ),
    )(seed_arr, x_bands)

    out = out[:oh, :, :nc]                                    # crop OH / lane padding
    return jnp.transpose(out, (2, 0, 1)).reshape(n, c, oh, ow)


def _unfold_ref(x, kh, kw, sh, sw):
    """Pure-JAX reference unfold: (N, C, H, W) -> (K, N, C, OH, OW)."""
    _, _, h, w = x.shape
    oh = (h - kh) // sh + 1
    ow = (w - kw) // sw + 1
    slabs = []
    for i in range(kh):
        for j in range(kw):
            slabs.append(x[:, :, i:i + sh * (oh - 1) + 1:sh,
                             j:j + sw * (ow - 1) + 1:sw])
    return jnp.stack(slabs, axis=0)


if __name__ == "__main__":
    key = jax.random.PRNGKey(0)
    x = jax.random.normal(key, (2, 4, 16, 16), dtype=jnp.float32)

    out = stochastic_pool2d(x, seed=0, kernel_size=3, stride=1)
    out = jax.block_until_ready(out)

    assert out.shape == (2, 4, 14, 14), out.shape
    assert out.dtype == x.dtype

    # Every output must equal one of the elements of its own 3x3 window
    # (the module gathers the original, pre-ReLU value at the sampled index).
    windows = _unfold_ref(x, 3, 3, 1, 1)                 # (9, N, C, OH, OW)
    member = jnp.any(windows == out[None, ...], axis=0)
    assert bool(jnp.all(member)), "output value not drawn from its window"

    print("KERNEL_OK")
</pallas_src>

<mosaic_0001>
module attributes {stable_mosaic.version = 11 : i64} {
  func.func @_stochastic_pool_kernel(%arg0: i32, %arg1: i32, %arg2: memref<1xi32, #tpu.memory_space<smem>>, %arg3: memref<1x6x16x8xf32, #tpu.memory_space<vmem>>, %arg4: memref<4x14x8xf32, #tpu.memory_space<vmem>>) attributes {dimension_semantics = [#tpu.dimension_semantics<parallel>, #tpu.dimension_semantics<parallel>], iteration_bounds = array<i64: 1, 4>, scalar_prefetch = 1 : i64, scratch_operands = 0 : i64, tpu.core_type = #tpu.core_type<tc>, window_params = [{transform_indices = @transform_0, window_bounds = array<i64: 1, 6, 16, 8>}, {transform_indices = @transform_1, window_bounds = array<i64: 4, 14, 8>}]} {
    %c1_i32 = arith.constant 1 : i32
    %0 = arith.muli %arg1, %c1_i32 : i32
    %1 = arith.addi %0, %arg0 : i32
    %c0 = arith.constant 0 : index
    %2 = memref.load %arg2[%c0] : memref<1xi32, #tpu.memory_space<smem>>
    %c-2048144789_i32 = arith.constant -2048144789 : i32
    %3 = arith.muli %1, %c-2048144789_i32 : i32
    %4 = arith.addi %2, %3 : i32
    %c-1640531535_i32 = arith.constant -1640531535 : i32
    %5 = arith.muli %4, %c-1640531535_i32 : i32
    %6 = tpu.iota {dimensions = array<i32: 0>} : vector<4x14x8xi32>
    %c14_i32 = arith.constant 14 : i32
    %7 = vector.broadcast %c14_i32 : i32 to vector<4x14x8xi32>
    %8 = arith.muli %6, %7 : vector<4x14x8xi32>
    %9 = tpu.iota {dimensions = array<i32: 1>} : vector<4x14x8xi32>
    %10 = arith.addi %8, %9 : vector<4x14x8xi32>
    %c8_i32 = arith.constant 8 : i32
    %11 = vector.broadcast %c8_i32 : i32 to vector<4x14x8xi32>
    %12 = arith.muli %10, %11 : vector<4x14x8xi32>
    %13 = tpu.iota {dimensions = array<i32: 2>} : vector<4x14x8xi32>
    %14 = arith.addi %12, %13 : vector<4x14x8xi32>
    %15 = vector.broadcast %5 : i32 to vector<4x14x8xi32>
    %16 = arith.xori %14, %15 : vector<4x14x8xi32>
    %c16_i32 = arith.constant 16 : i32
    %17 = vector.broadcast %c16_i32 : i32 to vector<4x14x8xi32>
    %18 = arith.shrui %16, %17 : vector<4x14x8xi32>
    %19 = arith.xori %16, %18 : vector<4x14x8xi32>
    %c-2048144789_i32_0 = arith.constant -2048144789 : i32
    %20 = vector.broadcast %c-2048144789_i32_0 : i32 to vector<4x14x8xi32>
    %21 = arith.muli %19, %20 : vector<4x14x8xi32>
    %c13_i32 = arith.constant 13 : i32
    %22 = vector.broadcast %c13_i32 : i32 to vector<4x14x8xi32>
    %23 = arith.shrui %21, %22 : vector<4x14x8xi32>
    %24 = arith.xori %21, %23 : vector<4x14x8xi32>
    %c-1028477387_i32 = arith.constant -1028477387 : i32
    %25 = vector.broadcast %c-1028477387_i32 : i32 to vector<4x14x8xi32>
    %26 = arith.muli %24, %25 : vector<4x14x8xi32>
    %c16_i32_1 = arith.constant 16 : i32
    %27 = vector.broadcast %c16_i32_1 : i32 to vector<4x14x8xi32>
    %28 = arith.shrui %26, %27 : vector<4x14x8xi32>
    %29 = arith.xori %26, %28 : vector<4x14x8xi32>
    %c8_i32_2 = arith.constant 8 : i32
    %30 = vector.broadcast %c8_i32_2 : i32 to vector<4x14x8xi32>
    %31 = arith.shrui %29, %30 : vector<4x14x8xi32>
    %32 = arith.sitofp %31 : vector<4x14x8xi32> to vector<4x14x8xf32>
    %cst = arith.constant 5.96046448E-8 : f32
    %33 = vector.broadcast %cst : f32 to vector<4x14x8xf32>
    %34 = arith.mulf %32, %33 : vector<4x14x8xf32>
    %c0_3 = arith.constant 0 : index
    %c0_4 = arith.constant 0 : index
    %c0_5 = arith.constant 0 : index
    %c0_6 = arith.constant 0 : index
    %35 = vector.load %arg3[%c0_3, %c0_4, %c0_5, %c0_6] : memref<1x6x16x8xf32, #tpu.memory_space<vmem>>, vector<1x4x14x8xf32>
    %36 = vector.shape_cast %35 : vector<1x4x14x8xf32> to vector<4x14x8xf32>
    %cst_7 = arith.constant 0.000000e+00 : f32
    %37 = vector.broadcast %cst_7 : f32 to vector<4x14x8xf32>
    %38 = arith.maximumf %36, %37 : vector<4x14x8xf32>
    %c0_8 = arith.constant 0 : index
    %c0_9 = arith.constant 0 : index
    %c1 = arith.constant 1 : index
    %c0_10 = arith.constant 0 : index
    %39 = vector.load %arg3[%c0_8, %c0_9, %c1, %c0_10] : memref<1x6x16x8xf32, #tpu.memory_space<vmem>>, vector<1x4x14x8xf32>
    %40 = vector.shape_cast %39 : vector<1x4x14x8xf32> to vector<4x14x8xf32>
    %cst_11 = arith.constant 0.000000e+00 : f32
    %41 = vector.broadcast %cst_11 : f32 to vector<4x14x8xf32>
    %42 = arith.maximumf %40, %41 : vector<4x14x8xf32>
    %43 = arith.addf %38, %42 : vector<4x14x8xf32>
    %c0_12 = arith.constant 0 : index
    %c0_13 = arith.constant 0 : index
    %c2 = arith.constant 2 : index
    %c0_14 = arith.constant 0 : index
    %44 = vector.load %arg3[%c0_12, %c0_13, %c2, %c0_14] : memref<1x6x16x8xf32, #tpu.memory_space<vmem>>, vector<1x4x14x8xf32>
    %45 = vector.shape_cast %44 : vector<1x4x14x8xf32> to vector<4x14x8xf32>
    %cst_15 = arith.constant 0.000000e+00 : f32
    %46 = vector.broadcast %cst_15 : f32 to vector<4x14x8xf32>
    %47 = arith.maximumf %45, %46 : vector<4x14x8xf32>
    %48 = arith.addf %43, %47 : vector<4x14x8xf32>
    %c0_16 = arith.constant 0 : index
    %c1_17 = arith.constant 1 : index
    %c0_18 = arith.constant 0 : index
    %c0_19 = arith.constant 0 : index
    %49 = vector.load %arg3[%c0_16, %c1_17, %c0_18, %c0_19] : memref<1x6x16x8xf32, #tpu.memory_space<vmem>>, vector<1x4x14x8xf32>
    %50 = vector.shape_cast %49 : vector<1x4x14x8xf32> to vector<4x14x8xf32>
    %cst_20 = arith.constant 0.000000e+00 : f32
    %51 = vector.broadcast %cst_20 : f32 to vector<4x14x8xf32>
    %52 = arith.maximumf %50, %51 : vector<4x14x8xf32>
    %53 = arith.addf %48, %52 : vector<4x14x8xf32>
    %c0_21 = arith.constant 0 : index
    %c1_22 = arith.constant 1 : index
    %c1_23 = arith.constant 1 : index
    %c0_24 = arith.constant 0 : index
    %54 = vector.load %arg3[%c0_21, %c1_22, %c1_23, %c0_24] : memref<1x6x16x8xf32, #tpu.memory_space<vmem>>, vector<1x4x14x8xf32>
    %55 = vector.shape_cast %54 : vector<1x4x14x8xf32> to vector<4x14x8xf32>
    %cst_25 = arith.constant 0.000000e+00 : f32
    %56 = vector.broadcast %cst_25 : f32 to vector<4x14x8xf32>
    %57 = arith.maximumf %55, %56 : vector<4x14x8xf32>
    %58 = arith.addf %53, %57 : vector<4x14x8xf32>
    %c0_26 = arith.constant 0 : index
    %c1_27 = arith.constant 1 : index
    %c2_28 = arith.constant 2 : index
    %c0_29 = arith.constant 0 : index
    %59 = vector.load %arg3[%c0_26, %c1_27, %c2_28, %c0_29] : memref<1x6x16x8xf32, #tpu.memory_space<vmem>>, vector<1x4x14x8xf32>
    %60 = vector.shape_cast %59 : vector<1x4x14x8xf32> to vector<4x14x8xf32>
    %cst_30 = arith.constant 0.000000e+00 : f32
    %61 = vector.broadcast %cst_30 : f32 to vector<4x14x8xf32>
    %62 = arith.maximumf %60, %61 : vector<4x14x8xf32>
    %63 = arith.addf %58, %62 : vector<4x14x8xf32>
    %c0_31 = arith.constant 0 : index
    %c2_32 = arith.constant 2 : index
    %c0_33 = arith.constant 0 : index
    %c0_34 = arith.constant 0 : index
    %64 = vector.load %arg3[%c0_31, %c2_32, %c0_33, %c0_34] : memref<1x6x16x8xf32, #tpu.memory_space<vmem>>, vector<1x4x14x8xf32>
    %65 = vector.shape_cast %64 : vector<1x4x14x8xf32> to vector<4x14x8xf32>
    %cst_35 = arith.constant 0.000000e+00 : f32
    %66 = vector.broadcast %cst_35 : f32 to vector<4x14x8xf32>
    %67 = arith.maximumf %65, %66 : vector<4x14x8xf32>
    %68 = arith.addf %63, %67 : vector<4x14x8xf32>
    %c0_36 = arith.constant 0 : index
    %c2_37 = arith.constant 2 : index
    %c1_38 = arith.constant 1 : index
    %c0_39 = arith.constant 0 : index
    %69 = vector.load %arg3[%c0_36, %c2_37, %c1_38, %c0_39] : memref<1x6x16x8xf32, #tpu.memory_space<vmem>>, vector<1x4x14x8xf32>
    %70 = vector.shape_cast %69 : vector<1x4x14x8xf32> to vector<4x14x8xf32>
    %cst_40 = arith.constant 0.000000e+00 : f32
    %71 = vector.broadcast %cst_40 : f32 to vector<4x14x8xf32>
    %72 = arith.maximumf %70, %71 : vector<4x14x8xf32>
    %73 = arith.addf %68, %72 : vector<4x14x8xf32>
    %c0_41 = arith.constant 0 : index
    %c2_42 = arith.constant 2 : index
    %c2_43 = arith.constant 2 : index
    %c0_44 = arith.constant 0 : index
    %74 = vector.load %arg3[%c0_41, %c2_42, %c2_43, %c0_44] : memref<1x6x16x8xf32, #tpu.memory_space<vmem>>, vector<1x4x14x8xf32>
    %75 = vector.shape_cast %74 : vector<1x4x14x8xf32> to vector<4x14x8xf32>
    %cst_45 = arith.constant 0.000000e+00 : f32
    %76 = vector.broadcast %cst_45 : f32 to vector<4x14x8xf32>
    %77 = arith.maximumf %75, %76 : vector<4x14x8xf32>
    %78 = arith.addf %73, %77 : vector<4x14x8xf32>
    %cst_46 = arith.constant 0.000000e+00 : f32
    %79 = vector.broadcast %cst_46 : f32 to vector<4x14x8xf32>
    %80 = arith.cmpf ogt, %78, %79 : vector<4x14x8xf32>
    %cst_47 = arith.constant 0.000000e+00 : f32
    %cst_48 = arith.constant 1.000000e+00 : f32
    %81 = vector.broadcast %cst_47 : f32 to vector<4x14x8xf32>
    %82 = vector.broadcast %cst_48 : f32 to vector<4x14x8xf32>
    %83 = arith.select %80, %81, %82 : vector<4x14x8xi1>, vector<4x14x8xf32>
    %cst_49 = arith.constant 9.000000e+00 : f32
    %84 = vector.broadcast %cst_49 : f32 to vector<4x14x8xf32>
    %85 = arith.select %80, %78, %84 : vector<4x14x8xi1>, vector<4x14x8xf32>
    %86 = arith.mulf %34, %85 : vector<4x14x8xf32>
    %c0_50 = arith.constant 0 : index
    %c0_51 = arith.constant 0 : index
    %c0_52 = arith.constant 0 : index
    %c0_53 = arith.constant 0 : index
    %87 = vector.load %arg3[%c0_50, %c0_51, %c0_52, %c0_53] : memref<1x6x16x8xf32, #tpu.memory_space<vmem>>, vector<1x4x14x8xf32>
    %88 = vector.shape_cast %87 : vector<1x4x14x8xf32> to vector<4x14x8xf32>
    %cst_54 = arith.constant 0.000000e+00 : f32
    %89 = vector.broadcast %cst_54 : f32 to vector<4x14x8xf32>
    %90 = arith.maximumf %88, %89 : vector<4x14x8xf32>
    %91 = arith.addf %90, %83 : vector<4x14x8xf32>
    %92 = arith.subf %86, %91 : vector<4x14x8xf32>
    %c0_55 = arith.constant 0 : index
    %c0_56 = arith.constant 0 : index
    %c1_57 = arith.constant 1 : index
    %c0_58 = arith.constant 0 : index
    %93 = vector.load %arg3[%c0_55, %c0_56, %c1_57, %c0_58] : memref<1x6x16x8xf32, #tpu.memory_space<vmem>>, vector<1x4x14x8xf32>
    %94 = vector.shape_cast %93 : vector<1x4x14x8xf32> to vector<4x14x8xf32>
    %cst_59 = arith.constant 0.000000e+00 : f32
    %95 = vector.broadcast %cst_59 : f32 to vector<4x14x8xf32>
    %96 = arith.maximumf %94, %95 : vector<4x14x8xf32>
    %97 = arith.addf %96, %83 : vector<4x14x8xf32>
    %cst_60 = arith.constant 0.000000e+00 : f32
    %98 = vector.broadcast %cst_60 : f32 to vector<4x14x8xf32>
    %99 = arith.cmpf oge, %92, %98 : vector<4x14x8xf32>
    %100 = arith.select %99, %94, %88 : vector<4x14x8xi1>, vector<4x14x8xf32>
    %101 = arith.subf %92, %97 : vector<4x14x8xf32>
    %c0_61 = arith.constant 0 : index
    %c0_62 = arith.constant 0 : index
    %c2_63 = arith.constant 2 : index
    %c0_64 = arith.constant 0 : index
    %102 = vector.load %arg3[%c0_61, %c0_62, %c2_63, %c0_64] : memref<1x6x16x8xf32, #tpu.memory_space<vmem>>, vector<1x4x14x8xf32>
    %103 = vector.shape_cast %102 : vector<1x4x14x8xf32> to vector<4x14x8xf32>
    %cst_65 = arith.constant 0.000000e+00 : f32
    %104 = vector.broadcast %cst_65 : f32 to vector<4x14x8xf32>
    %105 = arith.maximumf %103, %104 : vector<4x14x8xf32>
    %106 = arith.addf %105, %83 : vector<4x14x8xf32>
    %cst_66 = arith.constant 0.000000e+00 : f32
    %107 = vector.broadcast %cst_66 : f32 to vector<4x14x8xf32>
    %108 = arith.cmpf oge, %101, %107 : vector<4x14x8xf32>
    %109 = arith.select %108, %103, %100 : vector<4x14x8xi1>, vector<4x14x8xf32>
    %110 = arith.subf %101, %106 : vector<4x14x8xf32>
    %c0_67 = arith.constant 0 : index
    %c1_68 = arith.constant 1 : index
    %c0_69 = arith.constant 0 : index
    %c0_70 = arith.constant 0 : index
    %111 = vector.load %arg3[%c0_67, %c1_68, %c0_69, %c0_70] : memref<1x6x16x8xf32, #tpu.memory_space<vmem>>, vector<1x4x14x8xf32>
    %112 = vector.shape_cast %111 : vector<1x4x14x8xf32> to vector<4x14x8xf32>
    %cst_71 = arith.constant 0.000000e+00 : f32
    %113 = vector.broadcast %cst_71 : f32 to vector<4x14x8xf32>
    %114 = arith.maximumf %112, %113 : vector<4x14x8xf32>
    %115 = arith.addf %114, %83 : vector<4x14x8xf32>
    %cst_72 = arith.constant 0.000000e+00 : f32
    %116 = vector.broadcast %cst_72 : f32 to vector<4x14x8xf32>
    %117 = arith.cmpf oge, %110, %116 : vector<4x14x8xf32>
    %118 = arith.select %117, %112, %109 : vector<4x14x8xi1>, vector<4x14x8xf32>
    %119 = arith.subf %110, %115 : vector<4x14x8xf32>
    %c0_73 = arith.constant 0 : index
    %c1_74 = arith.constant 1 : index
    %c1_75 = arith.constant 1 : index
    %c0_76 = arith.constant 0 : index
    %120 = vector.load %arg3[%c0_73, %c1_74, %c1_75, %c0_76] : memref<1x6x16x8xf32, #tpu.memory_space<vmem>>, vector<1x4x14x8xf32>
    %121 = vector.shape_cast %120 : vector<1x4x14x8xf32> to vector<4x14x8xf32>
    %cst_77 = arith.constant 0.000000e+00 : f32
    %122 = vector.broadcast %cst_77 : f32 to vector<4x14x8xf32>
    %123 = arith.maximumf %121, %122 : vector<4x14x8xf32>
    %124 = arith.addf %123, %83 : vector<4x14x8xf32>
    %cst_78 = arith.constant 0.000000e+00 : f32
    %125 = vector.broadcast %cst_78 : f32 to vector<4x14x8xf32>
    %126 = arith.cmpf oge, %119, %125 : vector<4x14x8xf32>
    %127 = arith.select %126, %121, %118 : vector<4x14x8xi1>, vector<4x14x8xf32>
    %128 = arith.subf %119, %124 : vector<4x14x8xf32>
    %c0_79 = arith.constant 0 : index
    %c1_80 = arith.constant 1 : index
    %c2_81 = arith.constant 2 : index
    %c0_82 = arith.constant 0 : index
    %129 = vector.load %arg3[%c0_79, %c1_80, %c2_81, %c0_82] : memref<1x6x16x8xf32, #tpu.memory_space<vmem>>, vector<1x4x14x8xf32>
    %130 = vector.shape_cast %129 : vector<1x4x14x8xf32> to vector<4x14x8xf32>
    %cst_83 = arith.constant 0.000000e+00 : f32
    %131 = vector.broadcast %cst_83 : f32 to vector<4x14x8xf32>
    %132 = arith.maximumf %130, %131 : vector<4x14x8xf32>
    %133 = arith.addf %132, %83 : vector<4x14x8xf32>
    %cst_84 = arith.constant 0.000000e+00 : f32
    %134 = vector.broadcast %cst_84 : f32 to vector<4x14x8xf32>
    %135 = arith.cmpf oge, %128, %134 : vector<4x14x8xf32>
    %136 = arith.select %135, %130, %127 : vector<4x14x8xi1>, vector<4x14x8xf32>
    %137 = arith.subf %128, %133 : vector<4x14x8xf32>
    %c0_85 = arith.constant 0 : index
    %c2_86 = arith.constant 2 : index
    %c0_87 = arith.constant 0 : index
    %c0_88 = arith.constant 0 : index
    %138 = vector.load %arg3[%c0_85, %c2_86, %c0_87, %c0_88] : memref<1x6x16x8xf32, #tpu.memory_space<vmem>>, vector<1x4x14x8xf32>
    %139 = vector.shape_cast %138 : vector<1x4x14x8xf32> to vector<4x14x8xf32>
    %cst_89 = arith.constant 0.000000e+00 : f32
    %140 = vector.broadcast %cst_89 : f32 to vector<4x14x8xf32>
    %141 = arith.maximumf %139, %140 : vector<4x14x8xf32>
    %142 = arith.addf %141, %83 : vector<4x14x8xf32>
    %cst_90 = arith.constant 0.000000e+00 : f32
    %143 = vector.broadcast %cst_90 : f32 to vector<4x14x8xf32>
    %144 = arith.cmpf oge, %137, %143 : vector<4x14x8xf32>
    %145 = arith.select %144, %139, %136 : vector<4x14x8xi1>, vector<4x14x8xf32>
    %146 = arith.subf %137, %142 : vector<4x14x8xf32>
    %c0_91 = arith.constant 0 : index
    %c2_92 = arith.constant 2 : index
    %c1_93 = arith.constant 1 : index
    %c0_94 = arith.constant 0 : index
    %147 = vector.load %arg3[%c0_91, %c2_92, %c1_93, %c0_94] : memref<1x6x16x8xf32, #tpu.memory_space<vmem>>, vector<1x4x14x8xf32>
    %148 = vector.shape_cast %147 : vector<1x4x14x8xf32> to vector<4x14x8xf32>
    %cst_95 = arith.constant 0.000000e+00 : f32
    %149 = vector.broadcast %cst_95 : f32 to vector<4x14x8xf32>
    %150 = arith.maximumf %148, %149 : vector<4x14x8xf32>
    %151 = arith.addf %150, %83 : vector<4x14x8xf32>
    %cst_96 = arith.constant 0.000000e+00 : f32
    %152 = vector.broadcast %cst_96 : f32 to vector<4x14x8xf32>
    %153 = arith.cmpf oge, %146, %152 : vector<4x14x8xf32>
    %154 = arith.select %153, %148, %145 : vector<4x14x8xi1>, vector<4x14x8xf32>
    %155 = arith.subf %146, %151 : vector<4x14x8xf32>
    %c0_97 = arith.constant 0 : index
    %c2_98 = arith.constant 2 : index
    %c2_99 = arith.constant 2 : index
    %c0_100 = arith.constant 0 : index
    %156 = vector.load %arg3[%c0_97, %c2_98, %c2_99, %c0_100] : memref<1x6x16x8xf32, #tpu.memory_space<vmem>>, vector<1x4x14x8xf32>
    %157 = vector.shape_cast %156 : vector<1x4x14x8xf32> to vector<4x14x8xf32>
    %cst_101 = arith.constant 0.000000e+00 : f32
    %158 = vector.broadcast %cst_101 : f32 to vector<4x14x8xf32>
    %159 = arith.cmpf oge, %155, %158 : vector<4x14x8xf32>
    %160 = arith.select %159, %157, %154 : vector<4x14x8xi1>, vector<4x14x8xf32>
    %c0_102 = arith.constant 0 : index
    %c0_103 = arith.constant 0 : index
    %c0_104 = arith.constant 0 : index
    %161 = vector.load %arg4[%c0_102, %c0_103, %c0_104] : memref<4x14x8xf32, #tpu.memory_space<vmem>>, vector<4x14x8xf32>
    tpu.vector_store %arg4[%c0_102, %c0_103, %c0_104], %160 {strides = array<i32>} : memref<4x14x8xf32, #tpu.memory_space<vmem>>, vector<4x14x8xf32>,
    return
  }
  func.func @transform_0(%arg0: i32, %arg1: i32, %arg2: memref<1xi32, #tpu.memory_space<smem>>) -> (i32, i32, i32, i32) {
    %c0_i32 = arith.constant 0 : i32
    %c0_i32_0 = arith.constant 0 : i32
    %c0_i32_1 = arith.constant 0 : i32
    return %arg1, %c0_i32, %c0_i32_0, %arg0 : i32, i32, i32, i32
  }
  func.func @transform_1(%arg0: i32, %arg1: i32, %arg2: memref<1xi32, #tpu.memory_space<smem>>) -> (i32, i32, i32) {
    %c0_i32 = arith.constant 0 : i32
    %c0_i32_0 = arith.constant 0 : i32
    return %arg1, %c0_i32, %arg0 : i32, i32, i32
  }
}

</mosaic_0001>

<bundles_post_ra>
// kernel: stochastic_pool2d.1
= control target key start
LH: loop header
LB: loop body
LE: loop exit
PB: predicated region body
PF: predicated region fallthrough
CT: control target
= control target key end

     0   :  { %s1006_s11 = smov 0   ;;  %s1008_s12 = smov 0   ;;  %s1739_s0 = inlined_call_operand.<no memory space> [shape: s32[1], index: 0, kind: input, shape index: {}]   ;;  %s1740_s1 = inlined_call_operand.vmem [shape: f32[4,6,16,8], index: 1, kind: input, shape index: {}]   ;;  %s1741_s2 = inlined_call_operand.vmem [shape: f32[16,14,8], index: 2, kind: output, shape index: {}]  }
   0x1   :  { %7 = sst [smem:[#allocation3]] %s1739_s0  ;;  %s1010_s13 = smov 0  }
   0x2 LB: > { %s22_s0 = sadd.s32 1, %s981_s12  ;;  %p881_p0 = scmp.ge.s32.totalorder %s985_s13, 1  ;;  %s985_s13 = sphi %s1010_s13, %s13_s13   ;;  %s981_s12 = sphi %s1008_s12, %s2009_s12   ;;  %s977_s11 = sphi %s1006_s11, %s2008_s11  }
   0x3   : > { %p23_p1 = scmp.ge.s32.totalorder %s22_s0, 4  ;;  %p108_p2 = scmp.lt.s32.totalorder %s985_s13, 5 }
   0x5   : > { %s2011_s0 = smov (%p23_p1, %s22_s0), 0  ;;  %p109_p3 = pnand %p881_p0, %p108_p2 }
   0x7   : > { %112 = sbr.rel (%p109_p3) target bundleno = 164 (0xa4), region = 24 }
   0xc   : > { %p135_p4 = scmp.lt.s32.totalorder %s977_s11, 3  ;;  %v158_v0 = vlaneseq  ;;  %s154_s14 = sld [smem:[#allocation3]] }
   0xd   : > { %s155_s17 = smul.u32 2246822507, %s977_s11  ;;  %s883_s23 = sshll.u32 %s977_s11, 2 }
   0xe   : > { %s136_s15 = scalar_select %p135_p4, %s977_s11, 3  ;;  %v159_v1 = vshrl.u32 %v158_v0, 7  ;;  %v176_v2 = vand.u32 127, %v158_v0 }
   0xf   : > { %p1637_p5 = scmp.lt.s32.totalorder %s883_s23, 15 }
  0x10   : > { %s937_s16 = smul.u32 96, %s136_s15  ;;  %v160_v3 = vadd.s32 8, %v159_v1  ;;  %v161_v4 = vadd.s32 14, %v159_v1  ;;  %v163_v5 = vadd.s32 28, %v159_v1  ;;  %v165_v6 = vadd.s32 42, %v159_v1 }
  0x11   : > { %v167_v7 = vmul.u32 8, %v159_v1  ;;  %s2013_s23 = smov (!%p1637_p5, %s883_s23), 15 }
  0x12   : > { %s1032_s20 = scalar_lea.vmem %s1740_s1, %s937_s16  ;;  %v162_v8 = vadd.s32 14, %v160_v3  ;;  %v164_v9 = vadd.s32 28, %v160_v3  ;;  %v166_v10 = vadd.s32 42, %v160_v3  ;;  %v168_v11 = vmul.u32 8, %v160_v3  ;;  %s156_s21 = sadd.s32 %s155_s17, %s154_s14 }
  0x13   : > { %v169_v12 = vmul.u32 8, %v161_v4  ;;  %v171_v13 = vmul.u32 8, %v163_v5  ;;  %v177_v14 = vadd.s32 %v176_v2, %v167_v7  ;;  %v1035_v15 = vld [vmem:[%s1032_s20] sm:$0xff]  ;;  %s157_s22 = smul.u32 2654435761, %s156_s21  ;;  %v1042_v48 = vld [vmem:[%s1032_s20 + $0x10] sm:$0xff] }
  0x14   : > { %v170_v16 = vmul.u32 8, %v162_v8  ;;  %v172_v17 = vmul.u32 8, %v164_v9  ;;  %v178_v18 = vadd.s32 %v176_v2, %v168_v11  ;;  %v1751_v26 = vmax.f32 %v1035_v15, 0.0  ;;  %v1039_v47 = vld [vmem:[%s1032_s20 + $0x8] sm:$0x3f]  ;;  %s936_s25 = sshll.u32 %s2013_s23, 4 }
  0x15   : > { %v173_v19 = vmul.u32 8, %v165_v6  ;;  %v174_v20 = vmul.u32 8, %v166_v10  ;;  %v179_v21 = vadd.s32 %v176_v2, %v169_v12  ;;  %v181_v22 = vadd.s32 %v176_v2, %v171_v13  ;;  %s151_s28 = scalar_lea.vmem %s1741_s2, %s936_s25 }
  0x16   : > { %v180_v23 = vadd.s32 %v176_v2, %v170_v16  ;;  %v182_v24 = vadd.s32 %v176_v2, %v172_v17  ;;  %v185_v25 = vstv %s157_s22  ;;  %v1750_v59 = vmax.f32 %v1039_v47, 0.0 }
  0x17   : > { %v183_v27 = vadd.s32 %v176_v2, %v173_v19  ;;  %v184_v28 = vadd.s32 %v176_v2, %v174_v20  ;;  %v186_v29 = vxor.u32 %v185_v25, %v177_v14  ;;  %v187_v30 = vxor.u32 %v185_v25, %v178_v18 }
  0x18   : > { %v188_v31 = vxor.u32 %v185_v25, %v179_v21  ;;  %v189_v32 = vxor.u32 %v185_v25, %v180_v23  ;;  %v190_v33 = vxor.u32 %v185_v25, %v181_v22  ;;  %v191_v34 = vxor.u32 %v185_v25, %v182_v24 }
  0x19   : > { %v192_v35 = vxor.u32 %v185_v25, %v183_v27  ;;  %v193_v36 = vxor.u32 %v185_v25, %v184_v28  ;;  %v194_v37 = vshrl.u32 %v186_v29, 16  ;;  %v195_v38 = vshrl.u32 %v187_v30, 16 }
  0x1a   : > { %v196_v39 = vshrl.u32 %v188_v31, 16  ;;  %v197_v40 = vshrl.u32 %v189_v32, 16  ;;  %v198_v41 = vshrl.u32 %v190_v33, 16  ;;  %v199_v42 = vshrl.u32 %v191_v34, 16 }
  0x1b   : > { %v200_v43 = vshrl.u32 %v192_v35, 16  ;;  %v201_v44 = vshrl.u32 %v193_v36, 16  ;;  %v202_v45 = vxor.u32 %v194_v37, %v186_v29  ;;  %v203_v46 = vxor.u32 %v195_v38, %v187_v30 }
  0x1c   : > { %v204_v49 = vxor.u32 %v196_v39, %v188_v31  ;;  %v205_v50 = vxor.u32 %v197_v40, %v189_v32  ;;  %v206_v51 = vxor.u32 %v198_v41, %v190_v33  ;;  %v207_v52 = vxor.u32 %v199_v42, %v191_v34 }
  0x1d   : > { %v208_v53 = vxor.u32 %v200_v43, %v192_v35  ;;  %v209_v54 = vxor.u32 %v201_v44, %v193_v36  ;;  %v210_v55 = vmul.u32 2246822507, %v202_v45  ;;  %v211_v56 = vmul.u32 2246822507, %v203_v46 }
  0x1e   : > { %v212_v57 = vmul.u32 2246822507, %v204_v49  ;;  %v213_v58 = vmul.u32 2246822507, %v205_v50  ;;  %v1046_v60 = vmax.f32 %v1042_v48, 0.0 }
  0x1f   : > { %v214_v61 = vmul.u32 2246822507, %v206_v51  ;;  %v215_v62 = vmul.u32 2246822507, %v207_v52  ;;  %v218_v63 = vshrl.u32 %v210_v55, 13  ;;  %v219_v0 = vshrl.u32 %v211_v56, 13 }
  0x20   : > { %v216_v1 = vmul.u32 2246822507, %v208_v53  ;;  %v217_v2 = vmul.u32 2246822507, %v209_v54  ;;  %v220_v3 = vshrl.u32 %v212_v57, 13  ;;  %v221_v4 = vshrl.u32 %v213_v58, 13 }
  0x21   : > { %v222_v5 = vshrl.u32 %v214_v61, 13  ;;  %v223_v6 = vshrl.u32 %v215_v62, 13  ;;  %v226_v7 = vxor.u32 %v218_v63, %v210_v55  ;;  %v227_v8 = vxor.u32 %v219_v0, %v211_v56  ;;  %v1049_v49 = vld [vmem:[%s1032_s20 + $0x18] sm:$0x3f]  ;;  %v1052_v54 = vld [vmem:[%s1032_s20 + $0x20] sm:$0xff]  ;;  %v1058_v56 = vld [vmem:[%s1032_s20 + $0x30] sm:$0xff] }
  0x22   : > { %v224_v9 = vshrl.u32 %v216_v1, 13  ;;  %v225_v10 = vshrl.u32 %v217_v2, 13  ;;  %v228_v11 = vxor.u32 %v220_v3, %v212_v57  ;;  %v229_v12 = vxor.u32 %v221_v4, %v213_v58  ;;  %v1055_v55 = vld [vmem:[%s1032_s20 + $0x28] sm:$0x3f]  ;;  %v1061_v63 = vld [vmem:[%s1032_s20 + $0x38] sm:$0x3f] }
  0x23   : > { %v230_v13 = vxor.u32 %v222_v5, %v214_v61  ;;  %v231_v14 = vxor.u32 %v223_v6, %v215_v62  ;;  %v234_v16 = vmul.u32 3266489909, %v226_v7  ;;  %v235_v17 = vmul.u32 3266489909, %v227_v8  ;;  %v1064_v0 = vld [vmem:[%s1032_s20 + $0x9] sm:$0x3f] }
  0x24   : > { %v232_v18 = vxor.u32 %v224_v9, %v216_v1  ;;  %v233_v19 = vxor.u32 %v225_v10, %v217_v2  ;;  %v236_v20 = vmul.u32 3266489909, %v228_v11  ;;  %v237_v21 = vmul.u32 3266489909, %v229_v12  ;;  %v1071_v5 = vld [vmem:[%s1032_s20 + $0x1] sm:$0xff]  ;;  %v1074_v6 = vld [vmem:[%s1032_s20 + $0x11] sm:$0xff] }
  0x25   : > { %v238_v22 = vmul.u32 3266489909, %v230_v13  ;;  %v239_v23 = vmul.u32 3266489909, %v231_v14  ;;  %v242_v24 = vshrl.u32 %v234_v16, 16  ;;  %v243_v25 = vshrl.u32 %v235_v17, 16 }
  0x26   : > { %v240_v27 = vmul.u32 3266489909, %v232_v18  ;;  %v241_v28 = vmul.u32 3266489909, %v233_v19  ;;  %v244_v29 = vshrl.u32 %v236_v20, 16  ;;  %v245_v30 = vshrl.u32 %v237_v21, 16 }
  0x27   : > { %v246_v31 = vshrl.u32 %v238_v22, 16  ;;  %v247_v32 = vshrl.u32 %v239_v23, 16  ;;  %v250_v33 = vxor.u32 %v242_v24, %v234_v16  ;;  %v251_v34 = vxor.u32 %v243_v25, %v235_v17  ;;  %v1077_v7 = vld [vmem:[%s1032_s20 + $0x19] sm:$0x3f]  ;;  %v1084_v12 = vld [vmem:[%s1032_s20 + $0x21] sm:$0xff]  ;;  %v1090_v14 = vld [vmem:[%s1032_s20 + $0x31] sm:$0xff] }
  0x28   : > { %v248_v35 = vshrl.u32 %v240_v27, 16  ;;  %v249_v36 = vshrl.u32 %v241_v28, 16  ;;  %v252_v37 = vxor.u32 %v244_v29, %v236_v20  ;;  %v253_v38 = vxor.u32 %v245_v30, %v237_v21  ;;  %1845 = vst [vmem:[#allocation4_spill] sm:$0xff] %v1084_v12  ;;  %v1087_v13 = vld [vmem:[%s1032_s20 + $0x29] sm:$0x3f]  ;;  %1846 = vst [vmem:[#allocation5_spill] sm:$0xff] %v1090_v14 }
  0x29   : > { %v254_v39 = vxor.u32 %v246_v31, %v238_v22  ;;  %v255_v40 = vxor.u32 %v247_v32, %v239_v23  ;;  %v258_v41 = vshrl.u32 %v250_v33, 8  ;;  %v259_v42 = vshrl.u32 %v251_v34, 8  ;;  %v1101_v20 = vld [vmem:[%s1032_s20 + $0x39] sm:$0x3f]  ;;  %v1112_v25 = vld [vmem:[%s1032_s20 + $0xa] sm:$0x3f] }
  0x2a   : > { %v256_v43 = vxor.u32 %v248_v35, %v240_v27  ;;  %v257_v44 = vxor.u32 %v249_v36, %v241_v28  ;;  %v260_v45 = vshrl.u32 %v252_v37, 8  ;;  %v261_v46 = vshrl.u32 %v253_v38, 8  ;;  %1847 = vst [vmem:[#allocation6_spill] sm:$0xff] %v1112_v25  ;;  %v1121_v31 = vld [vmem:[%s1032_s20 + $0x2] sm:$0xff]  ;;  %v1124_v32 = vld [vmem:[%s1032_s20 + $0x12] sm:$0xff] }
  0x2b   : > { %v262_v50 = vshrl.u32 %v254_v39, 8  ;;  %v263_v51 = vshrl.u32 %v255_v40, 8  ;;  %v266_v52 = vcvt.s32.f32 %v258_v41  ;;  %v267_v53 = vcvt.s32.f32 %v259_v42  ;;  %1848 = vst [vmem:[#allocation7_spill] sm:$0xff] %v1121_v31  ;;  %1849 = vst [vmem:[#allocation8_spill] sm:$0xff] %v1124_v32  ;;  %v1135_v37 = vld [vmem:[%s1032_s20 + $0x1a] sm:$0x3f] }
  0x2c   : > { %v264_v57 = vshrl.u32 %v256_v43, 8  ;;  %v265_v58 = vshrl.u32 %v257_v44, 8  ;;  %v268_v61 = vcvt.s32.f32 %v260_v45  ;;  %v269_v62 = vcvt.s32.f32 %v261_v46  ;;  %1850 = vst [vmem:[#allocation9_spill] sm:$0xff] %v1135_v37  ;;  %v1149_v42 = vld [vmem:[%s1032_s20 + $0x22] sm:$0xff]  ;;  %v1152_v43 = vld [vmem:[%s1032_s20 + $0x2a] sm:$0x3f] }
  0x2d   : > { %v270_v1 = vcvt.s32.f32 %v262_v50  ;;  %v271_v2 = vcvt.s32.f32 %v263_v51  ;;  %v1066_v3 = vmul.f32 5.9604645e-08, %v266_v52  ;;  %v1068_v4 = vmul.f32 5.9604645e-08, %v267_v53  ;;  %1851 = vst [vmem:[#allocation10_spill] sm:$0xff] %v1149_v42  ;;  %1852 = vst [vmem:[#allocation11_spill] sm:$0xff] %v1152_v43  ;;  %v1155_v44 = vld [vmem:[%s1032_s20 + $0x32] sm:$0xff] }
  0x2e   : > { %v272_v8 = vcvt.s32.f32 %v264_v57  ;;  %v273_v9 = vcvt.s32.f32 %v265_v58  ;;  %v1079_v10 = vmul.f32 5.9604645e-08, %v268_v61  ;;  %v1081_v11 = vmul.f32 5.9604645e-08, %v269_v62  ;;  %1853 = vst [vmem:[#allocation12_spill] sm:$0xff] %v1155_v44  ;;  %v1170_v52 = vld [vmem:[%s1032_s20 + $0x3a] sm:$0x3f] }
  0x2f   : > { %v1092_v16 = vmul.f32 5.9604645e-08, %v270_v1  ;;  %v1094_v17 = vmul.f32 5.9604645e-08, %v271_v2  ;;  %v1749_v18 = vmax.f32 %v1049_v49, 0.0  ;;  %v1098_v19 = vmax.f32 %v1052_v54, 0.0  ;;  %1854 = vst [vmem:[#allocation13_spill] sm:$0xff] %v1170_v52 }
  0x30   : > { %v1103_v21 = vmul.f32 5.9604645e-08, %v272_v8  ;;  %v1105_v22 = vmul.f32 5.9604645e-08, %v273_v9  ;;  %v1748_v23 = vmax.f32 %v1055_v55, 0.0  ;;  %v1109_v24 = vmax.f32 %v1058_v56, 0.0  ;;  %v1173_v53 = vld [vmem:[%s1032_s20 + $0x18] sm:$0x3f] }
  0x31   : > { %v1747_v27 = vmax.f32 %v1061_v63, 0.0  ;;  %v1746_v28 = vmax.f32 %v1071_v5, 0.0  ;;  %v1745_v29 = vmax.f32 %v1064_v0, 0.0  ;;  %v1118_v30 = vmax.f32 %v1074_v6, 0.0  ;;  %1855 = vst [vmem:[#allocation14_spill] sm:$0xff] %v1173_v53 }
  0x32   : > { %v1744_v33 = vmax.f32 %v1077_v7, 0.0  ;;  %v1128_v34 = vmax.f32 %v1084_v12, 0.0  ;;  %v1742_v35 = vmax.f32 %v1087_v13, 0.0  ;;  %v1132_v36 = vmax.f32 %v1090_v14, 0.0  ;;  %v1185_v1 = vld [vmem:[%s1032_s20 + $0x28] sm:$0x3f] }
  0x33   : > { %v1743_v38 = vmax.f32 %v1101_v20, 0.0  ;;  %v314_v39 = vadd.f32 %v1746_v28, %v1751_v26  ;;  %v315_v40 = vadd.f32 %v1745_v29, %v1750_v59  ;;  %v316_v41 = vadd.f32 %v1118_v30, %v1046_v60  ;;  %1857 = vst [vmem:[#allocation16_spill] sm:$0xff] %v1185_v1 }
  0x34   : > { %v317_v45 = vadd.f32 %v1744_v33, %v1749_v18  ;;  %v318_v46 = vadd.f32 %v1128_v34, %v1098_v19  ;;  %v319_v50 = vadd.f32 %v1742_v35, %v1748_v23  ;;  %v320_v51 = vadd.f32 %v1132_v36, %v1109_v24  ;;  %v1205_v23 = vld [vmem:[%s1032_s20 + $0x40] sm:$0xff]  ;;  %v1208_v18 = vld [vmem:[%s1032_s20 + $0x48] sm:$0x3f] }
  0x35   : > { %v321_v57 = vadd.f32 %v1743_v38, %v1747_v27  ;;  %v1752_v58 = vmax.f32 %v1121_v31, 0.0  ;;  %v1753_v61 = vmax.f32 %v1112_v25, 0.0  ;;  %v1182_v62 = vmax.f32 %v1124_v32, 0.0  ;;  %v1196_v38 = vld [vmem:[%s1032_s20 + $0x38] sm:$0x3f]  ;;  %1861 = vst [vmem:[#allocation20_spill] sm:$0xff] %v1205_v23 }
  0x36   : > { %v1756_v2 = vmax.f32 %v1135_v37, 0.0  ;;  %v1189_v8 = vmax.f32 %v1149_v42, 0.0  ;;  %v1757_v9 = vmax.f32 %v1152_v43, 0.0  ;;  %v1193_v35 = vmax.f32 %v1155_v44, 0.0  ;;  %1860 = vst [vmem:[#allocation19_spill] sm:$0xff] %v1196_v38  ;;  %1862 = vst [vmem:[#allocation21_spill] sm:$0xff] %v1208_v18 }
  0x37   : > { %1856 = vst [vmem:[#allocation15_spill] sm:$0xff] %v1182_v62  ;;  %v338_v29 = vadd.f32 %v1752_v58, %v314_v39  ;;  %v339_v28 = vadd.f32 %v1753_v61, %v315_v40  ;;  %v340_v27 = vadd.f32 %v1182_v62, %v316_v41  ;;  %v1217_v58 = vld [vmem:[%s1032_s20 + $0x19] sm:$0x3f]  ;;  %v1864_v40 = vmax.f32 %v1170_v52, 0.0  ;;  %v1240_v44 = vld [vmem:[%s1032_s20 + $0x49] sm:$0x3f] }
  0x38   : > { %1858 = vst [vmem:[#allocation17_spill] sm:$0xff] %v1189_v8  ;;  %1859 = vst [vmem:[#allocation18_spill] sm:$0xff] %v1193_v35  ;;  %v341_v59 = vadd.f32 %v1756_v2, %v317_v45  ;;  %v342_v26 = vadd.f32 %v1189_v8, %v318_v46  ;;  %v343_v33 = vadd.f32 %v1757_v9, %v319_v50  ;;  %v1772_v61 = vmax.f32 %v1173_v53, 0.0  ;;  %v1225_v2 = vld [vmem:[%s1032_s20 + $0x29] sm:$0x3f]  ;;  %v1228_v46 = vld [vmem:[%s1032_s20 + $0x41] sm:$0xff] }
  0x39   : > { %v344_v39 = vadd.f32 %v1193_v35, %v320_v51  ;;  %1863 = vst [vmem:[#allocation22_spill] sm:$0xff] %v1217_v58  ;;  %v345_v41 = vadd.f32 %v1864_v40, %v321_v57  ;;  %1865 = vst [vmem:[#allocation23_spill] sm:$0xff] %v1225_v2  ;;  %v1231_v50 = vmax.f32 %v1205_v23, 0.0  ;;  %v363_v57 = vadd.f32 %v338_v29, %v1046_v60  ;;  %v1237_v9 = vld [vmem:[%s1032_s20 + $0x39] sm:$0x3f] }
  0x3a   : > { %1866 = vst [vmem:[#allocation24_spill] sm:$0xff] %v1228_v46  ;;  %v365_v40 = vadd.f32 %v340_v27, %v1098_v19  ;;  %1868 = vst [vmem:[#allocation26_spill] sm:$0xff] %v1237_v9  ;;  %v364_v45 = vadd.f32 %v1772_v61, %v339_v28  ;;  %v1870_v42 = vmax.f32 %v1185_v1, 0.0  ;;  %v367_v32 = vadd.f32 %v342_v26, %v1109_v24  ;;  %v1250_v29 = vld [vmem:[%s1032_s20 + $0x1a] sm:$0x3f] }
  0x3b   : > { %1867 = vst [vmem:[#allocation25_spill] sm:$0xff] %v1231_v50  ;;  %1869 = vst [vmem:[#allocation27_spill] sm:$0xff] %v1240_v44  ;;  %v1871_v51 = vmax.f32 %v1196_v38, 0.0  ;;  %v369_v27 = vadd.f32 %v1231_v50, %v344_v39  ;;  %v1873_v43 = vmax.f32 %v1208_v18, 0.0  ;;  %v1787_v53 = vmax.f32 %v1217_v58, 0.0  ;;  %v1270_v39 = vld [vmem:[%s1032_s20 + $0x42] sm:$0xff] }
  0x3c   : > { %v366_v23 = vadd.f32 %v1870_v42, %v341_v59  ;;  %1872 = vst [vmem:[#allocation28_spill] sm:$0xff] %v1250_v29  ;;  %v1258_v61 = vld [vmem:[%s1032_s20 + $0x2a] sm:$0x3f]  ;;  %v1261_v59 = vld [vmem:[%s1032_s20 + $0x3a] sm:$0x3f]  ;;  %1877 = vst [vmem:[#allocation32_spill] sm:$0xff] %v1270_v39  ;;  %v389_v28 = vadd.f32 %v365_v40, %v1128_v34 }
  0x3d   : > { %v368_v52 = vadd.f32 %v1871_v51, %v343_v33  ;;  %v370_v37 = vadd.f32 %v1873_v43, %v345_v41  ;;  %1874 = vst [vmem:[#allocation29_spill] sm:$0xff] %v1258_v61  ;;  %1875 = vst [vmem:[#allocation30_spill] sm:$0xff] %v1261_v59  ;;  %v1265_v33 = vmax.f32 %v1228_v46, 0.0  ;;  %v387_v43 = vadd.f32 %v363_v57, %v1118_v30  ;;  %v1273_v41 = vld [vmem:[%s1032_s20 + $0x4a] sm:$0x3f]  ;;  %v1294_v40 = vld [vmem:[%s1032_s20 + $0x50] sm:$0xff] }
  0x3e   : > { %1878 = vst [vmem:[#allocation33_spill] sm:$0xff] %v1273_v41  ;;  %v388_v51 = vadd.f32 %v1787_v53, %v364_v45  ;;  %v1879_v26 = vmax.f32 %v1225_v2, 0.0  ;;  %v391_v46 = vadd.f32 %v367_v32, %v1132_v36  ;;  %v1880_v38 = vmax.f32 %v1237_v9, 0.0  ;;  %v1288_v31 = vld [vmem:[%s1032_s20 + $0x28] sm:$0x3f]  ;;  %1884 = vst [vmem:[#allocation36_spill] sm:$0xff] %v1294_v40 }
  0x3f   : > { %1876 = vst [vmem:[#allocation31_spill] sm:$0xff] %v1265_v33  ;;  %v393_v57 = vadd.f32 %v1265_v33, %v369_v27  ;;  %v1881_v1 = vmax.f32 %v1240_v44, 0.0  ;;  %v1796_v58 = vmax.f32 %v1250_v29, 0.0  ;;  %1882 = vst [vmem:[#allocation34_spill] sm:$0xff] %v1288_v31  ;;  %v1291_v45 = vld [vmem:[%s1032_s20 + $0x38] sm:$0x3f] }
  0x40   : > { %v390_v18 = vadd.f32 %v1879_v26, %v366_v23  ;;  %v392_v42 = vadd.f32 %v1880_v38, %v368_v52  ;;  %1883 = vst [vmem:[#allocation35_spill] sm:$0xff] %v1291_v45  ;;  %v1299_v38 = vmax.f32 %v1270_v39, 0.0  ;;  %v413_v26 = vadd.f32 %v389_v28, %v1189_v8  ;;  %v1311_v23 = vld [vmem:[%s1032_s20 + $0x58] sm:$0x3f]  ;;  %v1352_v2 = vld [vmem:[%s1032_s20 + $0x2a] sm:$0x3f] }
  0x41   : > { %v394_v25 = vadd.f32 %v1881_v1, %v370_v37  ;;  %v1303_v37 = vld [vmem:[%s1032_s20 + $0x48] sm:$0x3f]  ;;  %v411_v1 = vadd.f32 %v387_v43, %v1182_v62  ;;  %v412_v27 = vadd.f32 %v1796_v58, %v388_v51  ;;  %v415_v53 = vadd.f32 %v391_v46, %v1193_v35  ;;  %1887 = vst [vmem:[#allocation39_spill] sm:$0xff] %v1311_v23  ;;  %v1324_v28 = vld [vmem:[%s1032_s20 + $0x39] sm:$0x3f] }
  0x42   : > { %1885 = vst [vmem:[#allocation37_spill] sm:$0xff] %v1299_v38  ;;  %1886 = vst [vmem:[#allocation38_spill] sm:$0xff] %v1303_v37  ;;  %v1888_v32 = vmax.f32 %v1258_v61, 0.0  ;;  %v1889_v52 = vmax.f32 %v1261_v59, 0.0  ;;  %v417_v9 = vadd.f32 %v1299_v38, %v393_v57  ;;  %v1890_v43 = vmax.f32 %v1273_v41, 0.0 }
  0x43   : > { %v1321_v51 = vld [vmem:[%s1032_s20 + $0x29] sm:$0x3f]  ;;  %1892 = vst [vmem:[#allocation41_spill] sm:$0xff] %v1324_v28  ;;  %v1811_v58 = vmax.f32 %v1291_v45, 0.0  ;;  %v438_v57 = vadd.f32 %v413_v26, %v1109_v24  ;;  %v1341_v46 = vld [vmem:[%s1032_s20 + $0x59] sm:$0x3f] }
  0x44   : > { %v414_v39 = vadd.f32 %v1888_v32, %v390_v18  ;;  %v416_v44 = vadd.f32 %v1889_v52, %v392_v42  ;;  %v418_v29 = vadd.f32 %v1890_v43, %v394_v25  ;;  %1891 = vst [vmem:[#allocation40_spill] sm:$0xff] %v1321_v51  ;;  %v1331_v59 = vld [vmem:[%s1032_s20 + $0x49] sm:$0x3f]  ;;  %v436_v25 = vadd.f32 %v411_v1, %v1098_v19  ;;  %v1338_v43 = vld [vmem:[%s1032_s20 + $0x51] sm:$0xff] }
  0x45   : > { %1893 = vst [vmem:[#allocation42_spill] sm:$0xff] %v1331_v59  ;;  %v440_v52 = vadd.f32 %v415_v53, %v1231_v50  ;;  %1894 = vst [vmem:[#allocation43_spill] sm:$0xff] %v1338_v43  ;;  %v1896_v18 = vmax.f32 %v1288_v31, 0.0  ;;  %v1897_v42 = vmax.f32 %v1303_v37, 0.0  ;;  %v1898_v1 = vmax.f32 %v1294_v40, 0.0 }
  0x46   : > { %1895 = vst [vmem:[#allocation44_spill] sm:$0xff] %v1341_v46  ;;  %v439_v41 = vadd.f32 %v1811_v58, %v414_v39  ;;  %1899 = vst [vmem:[#allocation45_spill] sm:$0xff] %v1352_v2  ;;  %v1900_v53 = vmax.f32 %v1311_v23, 0.0  ;;  %v1822_v62 = vmax.f32 %v1321_v51, 0.0  ;;  %v1823_v31 = vmax.f32 %v1324_v28, 0.0  ;;  %v1363_v39 = vld [vmem:[%s1032_s20 + $0x52] sm:$0xff] }
  0x47   : > { %v437_v32 = vadd.f32 %v1896_v18, %v412_v27  ;;  %v441_v61 = vadd.f32 %v1897_v42, %v416_v44  ;;  %v442_v26 = vadd.f32 %v1898_v1, %v417_v9  ;;  %v1360_v18 = vld [vmem:[%s1032_s20 + $0x3a] sm:$0x3f]  ;;  %1902 = vst [vmem:[#allocation47_spill] sm:$0xff] %v1363_v39  ;;  %v460_v9 = vadd.f32 %v436_v25, %v1128_v34  ;;  %v1370_v58 = vld [vmem:[%s1032_s20 + $0x4a] sm:$0x3f]  ;;  %v1921_v51 = vld [vmem:[#allocation6_spill] sm:$0xff] }
  0x48   : > { %v443_v50 = vadd.f32 %v1900_v53, %v418_v29  ;;  %1901 = vst [vmem:[#allocation46_spill] sm:$0xff] %v1360_v18  ;;  %v462_v1 = vadd.f32 %v438_v57, %v1132_v36  ;;  %1903 = vst [vmem:[#allocation48_spill] sm:$0xff] %v1370_v58  ;;  %v1373_v29 = vld [vmem:[%s1032_s20 + $0x5a] sm:$0x3f]  ;;  %v463_v27 = vadd.f32 %v1823_v31, %v439_v41  ;;  %v1905_v44 = vmax.f32 %v1331_v59, 0.0 }
  0x49   : > { %1904 = vst [vmem:[#allocation49_spill] sm:$0xff] %v1373_v29  ;;  %v461_v53 = vadd.f32 %v1822_v62, %v437_v32  ;;  %v464_v23 = vadd.f32 %v440_v52, %v1265_v33  ;;  %v1906_v42 = vmax.f32 %v1338_v43, 0.0  ;;  %v1907_v57 = vmax.f32 %v1341_v46, 0.0 }
  0x4a   : > { %v465_v40 = vadd.f32 %v1905_v44, %v441_v61  ;;  %v477_v45 = vmax.f32 %v1352_v2, 0.0  ;;  %v479_v14 = vmax.f32 %v1360_v18, 0.0  ;;  %v481_v32 = vmax.f32 %v1370_v58, 0.0 }
  0x4b   : > { %v466_v25 = vadd.f32 %v1906_v42, %v442_v26  ;;  %v467_v37 = vadd.f32 %v1907_v57, %v443_v50  ;;  %v482_v62 = vmax.f32 %v1363_v39, 0.0  ;;  %v483_v41 = vmax.f32 %v1373_v29, 0.0 }
  0x4c   : > { %v484_v52 = vadd.f32 %v460_v9, %v1189_v8  ;;  %v485_v31 = vadd.f32 %v477_v45, %v461_v53  ;;  %v486_v61 = vadd.f32 %v462_v1, %v1193_v35  ;;  %v487_v44 = vadd.f32 %v479_v14, %v463_v27 }
  0x4d   : > { %v488_v26 = vadd.f32 %v464_v23, %v1299_v38  ;;  %v489_v42 = vadd.f32 %v481_v32, %v465_v40  ;;  %v490_v50 = vadd.f32 %v482_v62, %v466_v25  ;;  %v491_v57 = vadd.f32 %v483_v41, %v467_v37  ;;  %v1923_v38 = vld [vmem:[#allocation15_spill] sm:$0xff] }
  0x4e   : > { %vm492_vm0 = vcmp.gt.f32.partialorder %v484_v52, 0.0  ;;  %vm493_vm1 = vcmp.gt.f32.partialorder %v485_v31, 0.0  ;;  %vm494_vm2 = vcmp.gt.f32.partialorder %v486_v61, 0.0  ;;  %vm495_vm3 = vcmp.gt.f32.partialorder %v487_v44, 0.0 }
  0x4f   : > { %vm496_vm4 = vcmp.gt.f32.partialorder %v488_v26, 0.0  ;;  %vm497_vm5 = vcmp.gt.f32.partialorder %v489_v42, 0.0  ;;  %vm498_vm6 = vcmp.gt.f32.partialorder %v490_v50, 0.0  ;;  %vm499_vm7 = vcmp.gt.f32.partialorder %v491_v57, 0.0 }
  0x50   : > { %v987_v29 = vmov 1.0   ;;  %v508_v1 = vsel %vm492_vm0, %v484_v52, 9.0  ;;  %v509_v53 = vsel %vm493_vm1, %v485_v31, 9.0  ;;  %v510_v25 = vsel %vm494_vm2, %v486_v61, 9.0 }
  0x51   : > { %v1395_v9 = vsel %vm492_vm0, 0.0, %v987_v29  ;;  %v1398_v45 = vsel %vm493_vm1, 0.0, %v987_v29  ;;  %v1401_v14 = vsel %vm494_vm2, 0.0, %v987_v29  ;;  %v1404_v62 = vsel %vm495_vm3, 0.0, %v987_v29 }
  0x52   : > { %v1407_v40 = vsel %vm496_vm4, 0.0, %v987_v29  ;;  %v1410_v23 = vsel %vm497_vm5, 0.0, %v987_v29  ;;  %v1413_v37 = vsel %vm498_vm6, 0.0, %v987_v29  ;;  %v1416_v27 = vsel %vm499_vm7, 0.0, %v987_v29 }
  0x53   : > { %v511_v32 = vsel %vm495_vm3, %v487_v44, 9.0  ;;  %v512_v41 = vsel %vm496_vm4, %v488_v26, 9.0  ;;  %v513_v39 = vsel %vm497_vm5, %v489_v42, 9.0  ;;  %v514_v58 = vsel %vm498_vm6, %v490_v50, 9.0 }
  0x54   : > { %v515_v18 = vsel %vm499_vm7, %v491_v57, 9.0  ;;  %v516_v2 = vmul.f32 %v508_v1, %v1066_v3  ;;  %v517_v29 = vmul.f32 %v509_v53, %v1068_v4  ;;  %v518_v52 = vmul.f32 %v510_v25, %v1079_v10 }
  0x55   : > { %v519_v31 = vmul.f32 %v511_v32, %v1081_v11  ;;  %v520_v61 = vmul.f32 %v512_v41, %v1092_v16  ;;  %v521_v44 = vmul.f32 %v513_v39, %v1094_v17  ;;  %v522_v26 = vmul.f32 %v514_v58, %v1103_v21 }
  0x56   : > { %v523_v42 = vmul.f32 %v515_v18, %v1105_v22  ;;  %v1908_v50 = vmax.f32 %v1035_v15, 0.0  ;;  %v1909_v3 = vmax.f32 %v1039_v47, 0.0  ;;  %v526_v10 = vadd.f32 %v1401_v14, %v1046_v60 }
  0x57   : > { %v1910_v11 = vmax.f32 %v1049_v49, 0.0  ;;  %v528_v17 = vadd.f32 %v1407_v40, %v1098_v19  ;;  %v1911_v21 = vmax.f32 %v1055_v55, 0.0  ;;  %v530_v58 = vadd.f32 %v1413_v37, %v1109_v24 }
  0x58   : > { %v524_v57 = vadd.f32 %v1395_v9, %v1908_v50  ;;  %v525_v4 = vadd.f32 %v1398_v45, %v1909_v3  ;;  %v1912_v18 = vmax.f32 %v1061_v63, 0.0  ;;  %v534_v25 = vsub.f32 %v518_v52, %v526_v10 }
  0x59   : > { %v527_v16 = vadd.f32 %v1404_v62, %v1910_v11  ;;  %v529_v22 = vadd.f32 %v1410_v23, %v1911_v21  ;;  %v536_v41 = vsub.f32 %v520_v61, %v528_v17  ;;  %v538_v3 = vsub.f32 %v522_v26, %v530_v58 }
  0x5a   : > { %v531_v39 = vadd.f32 %v1416_v27, %v1912_v18  ;;  %v532_v1 = vsub.f32 %v516_v2, %v524_v57  ;;  %v533_v53 = vsub.f32 %v517_v29, %v525_v4  ;;  %v1913_v46 = vmax.f32 %v1071_v5, 0.0 }
  0x5b   : > { %v535_v32 = vsub.f32 %v519_v31, %v527_v16  ;;  %v537_v50 = vsub.f32 %v521_v44, %v529_v22  ;;  %v1914_v21 = vmax.f32 %v1064_v0, 0.0  ;;  %v542_v28 = vadd.f32 %v1401_v14, %v1118_v30  ;;  %v1918_v22 = vld [vmem:[#allocation5_spill] sm:$0xff] }
  0x5c   : > { %v539_v11 = vsub.f32 %v523_v42, %v531_v39  ;;  %v540_v43 = vadd.f32 %v1395_v9, %v1913_v46  ;;  %v1915_v2 = vmax.f32 %v1077_v7, 0.0  ;;  %v544_v52 = vadd.f32 %v1407_v40, %v1128_v34 }
  0x5d   : > { %v541_v59 = vadd.f32 %v1398_v45, %v1914_v21  ;;  %v1916_v31 = vmax.f32 %v1087_v13, 0.0  ;;  %v546_v46 = vadd.f32 %v1413_v37, %v1132_v36  ;;  %v1917_v44 = vmax.f32 %v1101_v20, 0.0 }
  0x5e   : > { %v543_v29 = vadd.f32 %v1404_v62, %v1915_v2  ;;  %vm548_vm8 = vcmp.ge.f32.partialorder %v532_v1, 0.0  ;;  %vm549_vm9 = vcmp.ge.f32.partialorder %v533_v53, 0.0  ;;  %vm550_vm10 = vcmp.ge.f32.partialorder %v534_v25, 0.0 }
  0x5f   : > { %v545_v61 = vadd.f32 %v1410_v23, %v1916_v31  ;;  %v547_v26 = vadd.f32 %v1416_v27, %v1917_v44  ;;  %vm551_vm11 = vcmp.ge.f32.partialorder %v535_v32, 0.0  ;;  %vm552_vm12 = vcmp.ge.f32.partialorder %v536_v41, 0.0 }
  0x60   : > { %vm553_vm13 = vcmp.ge.f32.partialorder %v537_v50, 0.0  ;;  %vm554_vm14 = vcmp.ge.f32.partialorder %v538_v3, 0.0  ;;  %vm555_vm15 = vcmp.ge.f32.partialorder %v539_v11, 0.0  ;;  %v556_v42 = vsel %vm548_vm8, %v1071_v5, %v1035_v15 }
  0x61   : > { %v557_v57 = vsel %vm549_vm9, %v1064_v0, %v1039_v47  ;;  %v558_v4 = vsel %vm550_vm10, %v1074_v6, %v1042_v48  ;;  %v559_v10 = vsel %vm551_vm11, %v1077_v7, %v1049_v49  ;;  %v560_v16 = vsel %vm552_vm12, %v1084_v12, %v1052_v54  ;;  %v1919_v7 = vld [vmem:[#allocation7_spill] sm:$0xff] }
  0x62   : > { %v561_v17 = vsel %vm553_vm13, %v1087_v13, %v1055_v55  ;;  %v562_v58 = vsel %vm554_vm14, %v1918_v22, %v1058_v56  ;;  %v563_v15 = vsel %vm555_vm15, %v1101_v20, %v1061_v63  ;;  %v564_v5 = vsub.f32 %v532_v1, %v540_v43  ;;  %v1924_v63 = vld [vmem:[#allocation9_spill] sm:$0xff]  ;;  %v1926_v43 = vld [vmem:[#allocation11_spill] sm:$0xff] }
  0x63   : > { %v565_v47 = vsub.f32 %v533_v53, %v541_v59  ;;  %v566_v0 = vsub.f32 %v534_v25, %v542_v28  ;;  %v567_v18 = vsub.f32 %v535_v32, %v543_v29  ;;  %v568_v39 = vsub.f32 %v536_v41, %v544_v52  ;;  %v1928_v32 = vld [vmem:[#allocation13_spill] sm:$0xff]  ;;  %v1930_v29 = vld [vmem:[#allocation8_spill] sm:$0xff] }
  0x64   : > { %v569_v21 = vsub.f32 %v537_v50, %v545_v61  ;;  %v570_v2 = vsub.f32 %v538_v3, %v546_v46  ;;  %v571_v49 = vsub.f32 %v539_v11, %v547_v26  ;;  %v1920_v31 = vmax.f32 %v1919_v7, 0.0  ;;  %v1931_v46 = vld [vmem:[#allocation10_spill] sm:$0xff] }
  0x65   : > { %v1922_v55 = vmax.f32 %v1921_v51, 0.0  ;;  %v574_v22 = vadd.f32 %v1401_v14, %v1923_v38  ;;  %v1925_v20 = vmax.f32 %v1924_v63, 0.0  ;;  %v576_v28 = vadd.f32 %v1407_v40, %v1189_v8 }
  0x66   : > { %v572_v44 = vadd.f32 %v1395_v9, %v1920_v31  ;;  %v1927_v1 = vmax.f32 %v1926_v43, 0.0  ;;  %v578_v25 = vadd.f32 %v1413_v37, %v1193_v35  ;;  %v1929_v41 = vmax.f32 %v1928_v32, 0.0 }
  0x67   : > { %v573_v13 = vadd.f32 %v1398_v45, %v1922_v55  ;;  %v575_v59 = vadd.f32 %v1404_v62, %v1925_v20  ;;  %vm580_vm0 = vcmp.ge.f32.partialorder %v564_v5, 0.0  ;;  %vm581_vm1 = vcmp.ge.f32.partialorder %v565_v47, 0.0  ;;  %v1932_v55 = vld [vmem:[#allocation12_spill] sm:$0xff] }
  0x68   : > { %v577_v53 = vadd.f32 %v1410_v23, %v1927_v1  ;;  %v579_v50 = vadd.f32 %v1416_v27, %v1929_v41  ;;  %vm582_vm2 = vcmp.ge.f32.partialorder %v566_v0, 0.0  ;;  %vm583_vm3 = vcmp.ge.f32.partialorder %v567_v18, 0.0 }
  0x69   : > { %vm584_vm4 = vcmp.ge.f32.partialorder %v568_v39, 0.0  ;;  %vm585_vm5 = vcmp.ge.f32.partialorder %v569_v21, 0.0  ;;  %vm586_vm6 = vcmp.ge.f32.partialorder %v570_v2, 0.0  ;;  %vm587_vm7 = vcmp.ge.f32.partialorder %v571_v49, 0.0 }
  0x6a   : > { %v588_v3 = vsel %vm580_vm0, %v1919_v7, %v556_v42  ;;  %v589_v11 = vsel %vm581_vm1, %v1921_v51, %v557_v57  ;;  %v590_v52 = vsel %vm582_vm2, %v1930_v29, %v558_v4  ;;  %v591_v61 = vsel %vm583_vm3, %v1924_v63, %v559_v10  ;;  %v1933_v4 = vld [vmem:[#allocation14_spill] sm:$0xff] }
  0x6b   : > { %v592_v26 = vsel %vm584_vm4, %v1931_v46, %v560_v16  ;;  %v593_v31 = vsel %vm585_vm5, %v1926_v43, %v561_v17  ;;  %v594_v20 = vsel %vm586_vm6, %v1932_v55, %v562_v58  ;;  %v595_v1 = vsel %vm587_vm7, %v1928_v32, %v563_v15  ;;  %v1935_v58 = vld [vmem:[#allocation16_spill] sm:$0xff] }
  0x6c   : > { %v596_v41 = vsub.f32 %v564_v5, %v572_v44  ;;  %v597_v35 = vsub.f32 %v565_v47, %v573_v13  ;;  %v598_v8 = vsub.f32 %v566_v0, %v574_v22  ;;  %v599_v38 = vsub.f32 %v567_v18, %v575_v59  ;;  %v1937_v47 = vld [vmem:[#allocation19_spill] sm:$0xff] }
  0x6d   : > { %v600_v12 = vsub.f32 %v568_v39, %v576_v28  ;;  %v601_v42 = vsub.f32 %v569_v21, %v577_v53  ;;  %v602_v7 = vsub.f32 %v570_v2, %v578_v25  ;;  %v603_v51 = vsub.f32 %v571_v49, %v579_v50  ;;  %v1939_v39 = vld [vmem:[#allocation25_spill] sm:$0xff]  ;;  %v1942_v53 = vld [vmem:[#allocation20_spill] sm:$0xff] }
  0x6e   : > { %v604_v57 = vadd.f32 %v1395_v9, %v1046_v60  ;;  %v1934_v10 = vmax.f32 %v1933_v4, 0.0  ;;  %v606_v17 = vadd.f32 %v1401_v14, %v1098_v19  ;;  %v1936_v15 = vmax.f32 %v1935_v58, 0.0  ;;  %v1940_v21 = vld [vmem:[#allocation21_spill] sm:$0xff] }
  0x6f   : > { %v608_v22 = vadd.f32 %v1407_v40, %v1109_v24  ;;  %v1938_v0 = vmax.f32 %v1937_v47, 0.0  ;;  %v610_v60 = vadd.f32 %v1413_v37, %v1939_v39  ;;  %v1941_v2 = vmax.f32 %v1940_v21, 0.0 }
  0x70   : > { %v605_v16 = vadd.f32 %v1398_v45, %v1934_v10  ;;  %v607_v5 = vadd.f32 %v1404_v62, %v1936_v15  ;;  %vm612_vm8 = vcmp.ge.f32.partialorder %v596_v41, 0.0  ;;  %vm613_vm9 = vcmp.ge.f32.partialorder %v597_v35, 0.0 }
  0x71   : > { %v609_v18 = vadd.f32 %v1410_v23, %v1938_v0  ;;  %v611_v49 = vadd.f32 %v1416_v27, %v1941_v2  ;;  %vm614_vm10 = vcmp.ge.f32.partialorder %v598_v8, 0.0  ;;  %vm615_vm11 = vcmp.ge.f32.partialorder %v599_v38, 0.0 }
  0x72   : > { %vm616_vm12 = vcmp.ge.f32.partialorder %v600_v12, 0.0  ;;  %vm617_vm13 = vcmp.ge.f32.partialorder %v601_v42, 0.0  ;;  %vm618_vm14 = vcmp.ge.f32.partialorder %v602_v7, 0.0  ;;  %vm619_vm15 = vcmp.ge.f32.partialorder %v603_v51, 0.0 }
  0x73   : > { %v620_v44 = vsel %vm612_vm8, %v1042_v48, %v588_v3  ;;  %v621_v13 = vsel %vm613_vm9, %v1933_v4, %v589_v11  ;;  %v622_v63 = vsel %vm614_vm10, %v1052_v54, %v590_v52  ;;  %v623_v59 = vsel %vm615_vm11, %v1935_v58, %v591_v61  ;;  %v1943_v61 = vld [vmem:[#allocation22_spill] sm:$0xff] }
  0x74   : > { %v624_v28 = vsel %vm616_vm12, %v1058_v56, %v592_v26  ;;  %v625_v43 = vsel %vm617_vm13, %v1937_v47, %v593_v31  ;;  %v626_v25 = vsel %vm618_vm14, %v1942_v53, %v594_v20  ;;  %v627_v32 = vsel %vm619_vm15, %v1940_v21, %v595_v1  ;;  %v1945_v20 = vld [vmem:[#allocation23_spill] sm:$0xff] }
  0x75   : > { %v628_v50 = vsub.f32 %v596_v41, %v604_v57  ;;  %v629_v10 = vsub.f32 %v597_v35, %v605_v16  ;;  %v630_v15 = vsub.f32 %v598_v8, %v606_v17  ;;  %v631_v0 = vsub.f32 %v599_v38, %v607_v5  ;;  %v1947_v8 = vld [vmem:[#allocation26_spill] sm:$0xff]  ;;  %v1951_v17 = vld [vmem:[#allocation4_spill] sm:$0xff] }
  0x76   : > { %v632_v2 = vsub.f32 %v600_v12, %v608_v22  ;;  %v633_v48 = vsub.f32 %v601_v42, %v609_v18  ;;  %v634_v3 = vsub.f32 %v602_v7, %v610_v60  ;;  %v635_v11 = vsub.f32 %v603_v51, %v611_v49  ;;  %v1949_v42 = vld [vmem:[#allocation27_spill] sm:$0xff]  ;;  %v1952_v22 = vld [vmem:[#allocation5_spill] sm:$0xff]  ;;  %v1953_v60 = vld [vmem:[#allocation24_spill] sm:$0xff] }
  0x77   : > { %v636_v52 = vadd.f32 %v1395_v9, %v1118_v30  ;;  %v1944_v4 = vmax.f32 %v1943_v61, 0.0  ;;  %v638_v31 = vadd.f32 %v1401_v14, %v1128_v34  ;;  %v1946_v1 = vmax.f32 %v1945_v20, 0.0 }
  0x78   : > { %v640_v12 = vadd.f32 %v1407_v40, %v1132_v36  ;;  %v1948_v38 = vmax.f32 %v1947_v8, 0.0  ;;  %v642_v30 = vadd.f32 %v1413_v37, %v1265_v33  ;;  %v1950_v7 = vmax.f32 %v1949_v42, 0.0 }
  0x79   : > { %v637_v26 = vadd.f32 %v1398_v45, %v1944_v4  ;;  %v639_v35 = vadd.f32 %v1404_v62, %v1946_v1  ;;  %vm644_vm0 = vcmp.ge.f32.partialorder %v628_v50, 0.0  ;;  %vm645_vm1 = vcmp.ge.f32.partialorder %v629_v10, 0.0 }
  0x7a   : > { %v641_v41 = vadd.f32 %v1410_v23, %v1948_v38  ;;  %v643_v51 = vadd.f32 %v1416_v27, %v1950_v7  ;;  %vm646_vm2 = vcmp.ge.f32.partialorder %v630_v15, 0.0  ;;  %vm647_vm3 = vcmp.ge.f32.partialorder %v631_v0, 0.0 }
  0x7b   : > { %vm648_vm4 = vcmp.ge.f32.partialorder %v632_v2, 0.0  ;;  %vm649_vm5 = vcmp.ge.f32.partialorder %v633_v48, 0.0  ;;  %vm650_vm6 = vcmp.ge.f32.partialorder %v634_v3, 0.0  ;;  %vm651_vm7 = vcmp.ge.f32.partialorder %v635_v11, 0.0 }
  0x7c   : > { %v652_v57 = vsel %vm644_vm0, %v1074_v6, %v620_v44  ;;  %v653_v16 = vsel %vm645_vm1, %v1943_v61, %v621_v13  ;;  %v654_v58 = vsel %vm646_vm2, %v1951_v17, %v622_v63  ;;  %v655_v5 = vsel %vm647_vm3, %v1945_v20, %v623_v59  ;;  %v1954_v61 = vld [vmem:[#allocation15_spill] sm:$0xff]  ;;  %v1955_v59 = vld [vmem:[#allocation28_spill] sm:$0xff] }
  0x7d   : > { %v656_v47 = vsel %vm648_vm4, %v1952_v22, %v624_v28  ;;  %v657_v18 = vsel %vm649_vm5, %v1947_v8, %v625_v43  ;;  %v658_v21 = vsel %vm650_vm6, %v1953_v60, %v626_v25  ;;  %v659_v49 = vsel %vm651_vm7, %v1949_v42, %v627_v32  ;;  %v1957_v43 = vld [vmem:[#allocation17_spill] sm:$0xff] }
  0x7e   : > { %v660_v4 = vsub.f32 %v628_v50, %v636_v52  ;;  %v661_v1 = vsub.f32 %v629_v10, %v637_v26  ;;  %v662_v38 = vsub.f32 %v630_v15, %v638_v31  ;;  %v663_v7 = vsub.f32 %v631_v0, %v639_v35  ;;  %v1958_v8 = vld [vmem:[#allocation29_spill] sm:$0xff]  ;;  %v1960_v10 = vld [vmem:[#allocation18_spill] sm:$0xff] }
  0x7f   : > { %v664_v33 = vsub.f32 %v632_v2, %v640_v12  ;;  %v665_v6 = vsub.f32 %v633_v48, %v641_v41  ;;  %v666_v44 = vsub.f32 %v634_v3, %v642_v30  ;;  %v667_v13 = vsub.f32 %v635_v11, %v643_v51  ;;  %v1961_v0 = vld [vmem:[#allocation30_spill] sm:$0xff]  ;;  %v1963_v3 = vld [vmem:[#allocation37_spill] sm:$0xff] }
  0x80   : > { %v668_v63 = vadd.f32 %v1395_v9, %v1954_v61  ;;  %v1956_v20 = vmax.f32 %v1955_v59, 0.0  ;;  %v670_v25 = vadd.f32 %v1401_v14, %v1957_v43  ;;  %v1959_v32 = vmax.f32 %v1958_v8, 0.0  ;;  %v1964_v52 = vld [vmem:[#allocation33_spill] sm:$0xff]  ;;  %v1966_v61 = vld [vmem:[#allocation32_spill] sm:$0xff] }
  0x81   : > { %v672_v15 = vadd.f32 %v1407_v40, %v1960_v10  ;;  %v1962_v2 = vmax.f32 %v1961_v0, 0.0  ;;  %v674_v11 = vadd.f32 %v1413_v37, %v1963_v3  ;;  %v1965_v26 = vmax.f32 %v1964_v52, 0.0 }
  0x82   : > { %v669_v28 = vadd.f32 %v1398_v45, %v1956_v20  ;;  %v671_v50 = vadd.f32 %v1404_v62, %v1959_v32  ;;  %vm676_vm8 = vcmp.ge.f32.partialorder %v660_v4, 0.0  ;;  %vm677_vm9 = vcmp.ge.f32.partialorder %v661_v1, 0.0 }
  0x83   : > { %v673_v48 = vadd.f32 %v1410_v23, %v1962_v2  ;;  %v675_v31 = vadd.f32 %v1416_v27, %v1965_v26  ;;  %vm678_vm10 = vcmp.ge.f32.partialorder %v662_v38, 0.0  ;;  %vm679_vm11 = vcmp.ge.f32.partialorder %v663_v7, 0.0 }
  0x84   : > { %vm680_vm12 = vcmp.ge.f32.partialorder %v664_v33, 0.0  ;;  %vm681_vm13 = vcmp.ge.f32.partialorder %v665_v6, 0.0  ;;  %vm682_vm14 = vcmp.ge.f32.partialorder %v666_v44, 0.0  ;;  %vm683_vm15 = vcmp.ge.f32.partialorder %v667_v13, 0.0 }
  0x85   : > { %v684_v35 = vsel %vm676_vm8, %v1930_v29, %v652_v57  ;;  %v685_v12 = vsel %vm677_vm9, %v1955_v59, %v653_v16  ;;  %v686_v41 = vsel %vm678_vm10, %v1931_v46, %v654_v58  ;;  %v687_v30 = vsel %vm679_vm11, %v1958_v8, %v655_v5  ;;  %v1967_v5 = vld [vmem:[#allocation34_spill] sm:$0xff] }
  0x86   : > { %v688_v42 = vsel %vm680_vm12, %v1932_v55, %v656_v47  ;;  %v689_v51 = vsel %vm681_vm13, %v1961_v0, %v657_v18  ;;  %v690_v20 = vsel %vm682_vm14, %v1966_v61, %v658_v21  ;;  %v691_v43 = vsel %vm683_vm15, %v1964_v52, %v659_v49  ;;  %v1969_v49 = vld [vmem:[#allocation35_spill] sm:$0xff] }
  0x87   : > { %v692_v32 = vsub.f32 %v660_v4, %v668_v63  ;;  %v693_v10 = vsub.f32 %v661_v1, %v669_v28  ;;  %v694_v2 = vsub.f32 %v662_v38, %v670_v25  ;;  %v695_v3 = vsub.f32 %v663_v7, %v671_v50  ;;  %v1971_v38 = vld [vmem:[#allocation38_spill] sm:$0xff]  ;;  %v1975_v63 = vld [vmem:[#allocation39_spill] sm:$0xff] }
  0x88   : > { %v696_v26 = vsub.f32 %v664_v33, %v672_v15  ;;  %v697_v29 = vsub.f32 %v665_v6, %v673_v48  ;;  %v698_v57 = vsub.f32 %v666_v44, %v674_v11  ;;  %v699_v16 = vsub.f32 %v667_v13, %v675_v31  ;;  %v1973_v44 = vld [vmem:[#allocation36_spill] sm:$0xff] }
  0x89   : > { %v700_v58 = vadd.f32 %v1395_v9, %v1098_v19  ;;  %v1968_v47 = vmax.f32 %v1967_v5, 0.0  ;;  %v702_v21 = vadd.f32 %v1401_v14, %v1109_v24  ;;  %v1970_v4 = vmax.f32 %v1969_v49, 0.0 }
  0x8a   : > { %v704_v33 = vadd.f32 %v1407_v40, %v1939_v39  ;;  %v1972_v7 = vmax.f32 %v1971_v38, 0.0  ;;  %v1974_v19 = vmax.f32 %v1973_v44, 0.0  ;;  %v1976_v59 = vmax.f32 %v1975_v63, 0.0 }
  0x8b   : > { %v701_v18 = vadd.f32 %v1398_v45, %v1968_v47  ;;  %v703_v1 = vadd.f32 %v1404_v62, %v1970_v4  ;;  %vm708_vm0 = vcmp.ge.f32.partialorder %v692_v32, 0.0  ;;  %vm709_vm1 = vcmp.ge.f32.partialorder %v693_v10, 0.0 }
  0x8c   : > { %v705_v6 = vadd.f32 %v1410_v23, %v1972_v7  ;;  %v706_v13 = vadd.f32 %v1413_v37, %v1974_v19  ;;  %v707_v28 = vadd.f32 %v1416_v27, %v1976_v59  ;;  %vm710_vm2 = vcmp.ge.f32.partialorder %v694_v2, 0.0  ;;  %v2003_v59 = vld [vmem:[#allocation45_spill] sm:$0xff] }
  0x8d   : > { %vm711_vm3 = vcmp.ge.f32.partialorder %v695_v3, 0.0  ;;  %vm712_vm4 = vcmp.ge.f32.partialorder %v696_v26, 0.0  ;;  %vm713_vm5 = vcmp.ge.f32.partialorder %v697_v29, 0.0  ;;  %vm714_vm6 = vcmp.ge.f32.partialorder %v698_v57, 0.0 }
  0x8e   : > { %vm715_vm7 = vcmp.ge.f32.partialorder %v699_v16, 0.0  ;;  %v716_v24 = vsel %vm708_vm0, %v1052_v54, %v684_v35  ;;  %v717_v39 = vsel %vm709_vm1, %v1967_v5, %v685_v12  ;;  %v718_v25 = vsel %vm710_vm2, %v1058_v56, %v686_v41 }
  0x8f   : > { %v719_v8 = vsel %vm711_vm3, %v1969_v49, %v687_v30  ;;  %v720_v50 = vsel %vm712_vm4, %v1942_v53, %v688_v42  ;;  %v721_v15 = vsel %vm713_vm5, %v1971_v38, %v689_v51  ;;  %v722_v0 = vsel %vm714_vm6, %v1973_v44, %v690_v20  ;;  %v1978_v30 = vld [vmem:[#allocation40_spill] sm:$0xff] }
  0x90   : > { %v723_v48 = vsel %vm715_vm7, %v1975_v63, %v691_v43  ;;  %v724_v11 = vsub.f32 %v692_v32, %v700_v58  ;;  %v725_v54 = vsub.f32 %v693_v10, %v701_v18  ;;  %v726_v56 = vsub.f32 %v694_v2, %v702_v21  ;;  %v1980_v43 = vld [vmem:[#allocation41_spill] sm:$0xff]  ;;  %v1982_v2 = vld [vmem:[#allocation31_spill] sm:$0xff]  ;;  %v1987_v58 = vld [vmem:[#allocation44_spill] sm:$0xff] }
  0x91   : > { %v727_v52 = vsub.f32 %v695_v3, %v703_v1  ;;  %v728_v31 = vsub.f32 %v696_v26, %v704_v33  ;;  %v729_v35 = vsub.f32 %v697_v29, %v705_v6  ;;  %v730_v53 = vsub.f32 %v698_v57, %v706_v13  ;;  %v1983_v26 = vld [vmem:[#allocation42_spill] sm:$0xff] }
  0x92   : > { %v731_v12 = vsub.f32 %v699_v16, %v707_v28  ;;  %v732_v41 = vadd.f32 %v1395_v9, %v1128_v34  ;;  %v1979_v42 = vmax.f32 %v1978_v30, 0.0  ;;  %v734_v20 = vadd.f32 %v1401_v14, %v1132_v36  ;;  %v1985_v16 = vld [vmem:[#allocation43_spill] sm:$0xff] }
  0x93   : > { %v1981_v32 = vmax.f32 %v1980_v43, 0.0  ;;  %v736_v3 = vadd.f32 %v1407_v40, %v1982_v2  ;;  %v1984_v29 = vmax.f32 %v1983_v26, 0.0  ;;  %v1986_v34 = vmax.f32 %v1985_v16, 0.0 }
  0x94   : > { %v733_v51 = vadd.f32 %v1398_v45, %v1979_v42  ;;  %v1988_v45 = vmax.f32 %v1987_v58, 0.0  ;;  %vm740_vm8 = vcmp.ge.f32.partialorder %v724_v11, 0.0  ;;  %vm741_vm9 = vcmp.ge.f32.partialorder %v725_v54, 0.0 }
  0x95   : > { %v735_v10 = vadd.f32 %v1404_v62, %v1981_v32  ;;  %v737_v57 = vadd.f32 %v1410_v23, %v1984_v29  ;;  %v738_v9 = vadd.f32 %v1413_v37, %v1986_v34  ;;  %vm742_vm10 = vcmp.ge.f32.partialorder %v726_v56, 0.0 }
  0x96   : > { %v739_v5 = vadd.f32 %v1416_v27, %v1988_v45  ;;  %vm743_vm11 = vcmp.ge.f32.partialorder %v727_v52, 0.0  ;;  %vm744_vm12 = vcmp.ge.f32.partialorder %v728_v31, 0.0  ;;  %vm745_vm13 = vcmp.ge.f32.partialorder %v729_v35, 0.0 }
  0x97   : > { %vm746_vm14 = vcmp.ge.f32.partialorder %v730_v53, 0.0  ;;  %vm747_vm15 = vcmp.ge.f32.partialorder %v731_v12, 0.0  ;;  %v748_v36 = vsel %vm740_vm8, %v1951_v17, %v716_v24  ;;  %v749_v14 = vsel %vm741_vm9, %v1978_v30, %v717_v39  ;;  %v2004_v39 = vld [vmem:[#allocation46_spill] sm:$0xff] }
  0x98   : > { %v750_v62 = vsel %vm742_vm10, %v1952_v22, %v718_v25  ;;  %v751_v40 = vsel %vm743_vm11, %v1980_v43, %v719_v8  ;;  %v752_v23 = vsel %vm744_vm12, %v1953_v60, %v720_v50  ;;  %v753_v37 = vsel %vm745_vm13, %v1983_v26, %v721_v15  ;;  %v2005_v50 = vld [vmem:[#allocation48_spill] sm:$0xff]  ;;  %v2006_v15 = vld [vmem:[#allocation47_spill] sm:$0xff] }
  0x99   : > { %v754_v27 = vsel %vm746_vm14, %v1985_v16, %v722_v0  ;;  %v755_v47 = vsel %vm747_vm15, %v1987_v58, %v723_v48  ;;  %v756_v18 = vsub.f32 %v724_v11, %v732_v41  ;;  %v757_v21 = vsub.f32 %v725_v54, %v733_v51  ;;  %v2007_v48 = vld [vmem:[#allocation49_spill] sm:$0xff] }
  0x9a   : > { %v758_v49 = vsub.f32 %v726_v56, %v734_v20  ;;  %v759_v4 = vsub.f32 %v727_v52, %v735_v10  ;;  %v760_v17 = vsub.f32 %v728_v31, %v736_v3  ;;  %v761_v1 = vsub.f32 %v729_v35, %v737_v57 }
  0x9b   : > { %v762_v33 = vsub.f32 %v730_v53, %v738_v9  ;;  %v763_v38 = vsub.f32 %v731_v12, %v739_v5  ;;  %vm1677_vm0 = vcmp.ge.f32.partialorder %v756_v18, 0.0  ;;  %vm1681_vm1 = vcmp.ge.f32.partialorder %v757_v21, 0.0 }
  0x9c   : > { %vm1685_vm2 = vcmp.ge.f32.partialorder %v758_v49, 0.0  ;;  %vm1689_vm3 = vcmp.ge.f32.partialorder %v759_v4, 0.0  ;;  %vm1693_vm4 = vcmp.ge.f32.partialorder %v760_v17, 0.0  ;;  %vm1700_vm5 = vcmp.ge.f32.partialorder %v761_v1, 0.0 }
  0x9d   : > { %vm770_vm6 = vcmp.ge.f32.partialorder %v762_v33, 0.0  ;;  %vm1704_vm7 = vcmp.ge.f32.partialorder %v763_v38, 0.0  ;;  %v772_v63 = vsel %vm1677_vm0, %v1931_v46, %v748_v36  ;;  %v773_v28 = vsel %vm1681_vm1, %v2003_v59, %v749_v14 }
  0x9e   : > { %v774_v24 = vsel %vm1685_vm2, %v1932_v55, %v750_v62  ;;  %v775_v25 = vsel %vm1689_vm3, %v2004_v39, %v751_v40  ;;  %v776_v8 = vsel %vm1693_vm4, %v1966_v61, %v752_v23  ;;  %v777_v46 = vsel %vm1700_vm5, %v2005_v50, %v753_v37 }
  0x9f   : > { %v778_v0 = vsel %vm770_vm6, %v2006_v15, %v754_v27  ;;  %v779_v11 = vsel %vm1704_vm7, %v2007_v48, %v755_v47  ;;  %vm780_vm8 = vcmask 64512   ;;  %vm782_vm9 = vcmask 62464  }
  0xa0   : > { %781 = vst.msk [vmem:[%s151_s28] sm:$0xff] %vm780_vm8, %v772_v63  ;;  %784 = vst.msk [vmem:[%s151_s28 + $0x10] sm:$0xff] %vm780_vm8, %v774_v24 }
  0xa1   : > { %786 = vst.msk [vmem:[%s151_s28 + $0x20] sm:$0xff] %vm780_vm8, %v776_v8  ;;  %788 = vst.msk [vmem:[%s151_s28 + $0x30] sm:$0xff] %vm780_vm8, %v778_v0 }
  0xa2   : > { %783 = vst.msk [vmem:[%s151_s28 + $0x8] sm:$0x3f] %vm782_vm9, %v773_v28  ;;  %785 = vst.msk [vmem:[%s151_s28 + $0x18] sm:$0x3f] %vm782_vm9, %v775_v25 }
  0xa3   : > { %787 = vst.msk [vmem:[%s151_s28 + $0x28] sm:$0x3f] %vm782_vm9, %v777_v46  ;;  %789 = vst.msk [vmem:[%s151_s28 + $0x38] sm:$0x3f] %vm782_vm9, %v779_v11 }
  0xa4 PF: > { %s13_s13 = sadd.s32 1, %s985_s13   ;;  %s2008_s11 = smov %s981_s12 }
  0xa5   : > { %p10_p6 = scmp.ge.s32.totalorder %s13_s13, 6   ;;  %s2009_s12 = smov %s2011_s0 }
  0xa7   :  { %12 = sbr.rel (!%p10_p6) target bundleno = 2 (0x2), region = 56 }

</bundles_post_ra>
